<compile_context>
chip_gen: v7x
topology: tpu7x:2x2x1
jax: 0.10.0
libtpu: 0.0.40
codegen_flags: <defaults>
</compile_context>

<pallas_src>
import functools

import jax
import jax.numpy as jnp
import numpy as np
from jax import lax
from jax.experimental import pallas as pl
from jax.experimental.pallas import tpu as pltpu

BN_EPS = 1e-5


# ----------------------------------------------------------------------------
# Host-side constants.
# ----------------------------------------------------------------------------
def _tap_masks(H, W):
    """(9, H*W) 0/1 masks: mask[k][p] == 1 iff the (dy,dx)=divmod(k,3) tap of output
    position p reads an in-image input position (padding=1 3x3 conv)."""
    hh, ww = np.divmod(np.arange(H * W), W)
    rows = []
    for dy in range(3):
        for dx in range(3):
            h2, w2 = hh + dy - 1, ww + dx - 1
            rows.append(((h2 >= 0) & (h2 < H) & (w2 >= 0) & (w2 < W)).astype(np.float32))
    return jnp.asarray(np.stack(rows, axis=0))


def _pool_selector(H, W):
    """(H*W, Ho*Wo) one-hot gather: picks the top-left lane of every 2x2 window."""
    Ho, Wo = H // 2, W // 2
    sel = np.zeros((H * W, Ho * Wo), np.float32)
    for a in range(Ho):
        for b in range(Wo):
            sel[(2 * a) * W + 2 * b, a * Wo + b] = 1.0
    return jnp.asarray(sel)


# ----------------------------------------------------------------------------
# Single fused kernel (whole batch resident in VMEM).
# ----------------------------------------------------------------------------
def _fused_downsample_kernel(x_ref, t_ref, masks_ref, sel_ref,
                             w1_ref, b1_ref, g1_ref, be1_ref,
                             wt_ref, bt_ref,
                             w2_ref, b2_ref, g2_ref, be2_ref,
                             res_ref, pool_ref, *, N, W, HW, HoWo):
    masks = masks_ref[...]                                   # (9, HW) border masks
    inv_count = 1.0 / float(N * HW)

    def conv3x3(h, w_ref, b_ref):
        # In-register im2col: 9 lane-rotated, border-masked taps -> (9*C, HW),
        # then ONE MXU matmul with the bias folded into the epilogue.
        taps = []
        for k in range(9):
            dy, dx = divmod(k, 3)
            off = (dy - 1) * W + (dx - 1)
            if off == 0:
                taps.append(h)                               # centre tap: always valid
            else:
                rolled = pltpu.roll(h, shift=(-off) % HW, axis=1)  # tap[p] = h[p + off]
                taps.append(rolled * masks[k:k + 1, :])
        im2col = jnp.concatenate(taps, axis=0)               # (9*C, HW), tap-major rows
        return jnp.dot(w_ref[...], im2col,
                       preferred_element_type=jnp.float32) + b_ref[...]

    def bn_affine(ys, g_ref, be_ref):
        # Training-mode BatchNorm over (batch, H, W): biased variance, eps=1e-5.
        s = sum(jnp.sum(y, axis=1, keepdims=True) for y in ys)
        q = sum(jnp.sum(y * y, axis=1, keepdims=True) for y in ys)
        mean = s * inv_count
        var = q * inv_count - mean * mean                    # single-pass f32 (tiny values)
        scale = g_ref[...] * lax.rsqrt(var + BN_EPS)
        shift = be_ref[...] - mean * scale
        return scale, shift

    # ---- conv1 + bias (per image) and BN1 batch statistics, all in VMEM ----
    y1 = [conv3x3(x_ref[n], w1_ref, b1_ref) for n in range(N)]
    sc1, sh1 = bn_affine(y1, g1_ref, be1_ref)

    # ---- BN1 + ReLU + time-embedding (Linear + ReLU) broadcast-add + conv2 + bias ----
    y2 = []
    for n in range(N):
        temb = jnp.maximum(
            jnp.sum(wt_ref[...] * t_ref[n], axis=1, keepdims=True) + bt_ref[...], 0.0)
        h = jnp.maximum(y1[n] * sc1 + sh1, 0.0) + temb
        y2.append(conv3x3(h, w2_ref, b2_ref))
    sc2, sh2 = bn_affine(y2, g2_ref, be2_ref)

    # ---- BN2 + ReLU -> residual; fused 2x2/stride-2 max-pool -> pooled ----
    sel = sel_ref[...]                                       # (HW, HoWo) one-hot gather
    for n in range(N):
        r = jnp.maximum(y2[n] * sc2 + sh2, 0.0)              # (Cout, HW)
        res_ref[n] = r
        # max over the 2x2 window anchored at p; wrapped positions are never gathered.
        hmax = jnp.maximum(r, pltpu.roll(r, shift=HW - 1, axis=1))        # max(r[p], r[p+1])
        vmax = jnp.maximum(hmax, pltpu.roll(hmax, shift=HW - W, axis=1))  # + row below
        pool_ref[:, pl.ds(n * HoWo, HoWo)] = jnp.dot(
            vmax, sel, preferred_element_type=jnp.float32)   # (Cout, HoWo)


# ----------------------------------------------------------------------------
# Full downsample_block forward (one pallas_call).
# ----------------------------------------------------------------------------
@jax.jit
def downsample_block_forward(x_nchw, time_embeddings, params):
    N, Cin, H, W = x_nchw.shape
    Cout, T = params["wt"].shape
    HW = H * W
    Ho, Wo = H // 2, W // 2
    HoWo = Ho * Wo
    Cin_p = ((Cin + 7) // 8) * 8          # pad input channels to a sublane tile

    x_flat = x_nchw.reshape(N, Cin, HW).astype(jnp.float32)   # free reshape (NCHW)
    if Cin_p != Cin:
        x_flat = jnp.pad(x_flat, ((0, 0), (0, Cin_p - Cin), (0, 0)))
    t_col = time_embeddings.reshape(N, 1, T).astype(jnp.float32)

    masks = _tap_masks(H, W)
    sel = _pool_selector(H, W)

    # Conv weights in tap-major (dy, dx, cin) layout: (Cout, 9*C).
    w1 = params["w1"].astype(jnp.float32)
    if Cin_p != Cin:
        w1 = jnp.pad(w1, ((0, 0), (0, Cin_p - Cin), (0, 0), (0, 0)))
    w1m = jnp.transpose(w1, (0, 2, 3, 1)).reshape(Cout, 9 * Cin_p)
    w2m = jnp.transpose(params["w2"], (0, 2, 3, 1)).reshape(Cout, 9 * Cout).astype(jnp.float32)
    b1 = params["b1"].reshape(Cout, 1).astype(jnp.float32)
    b2 = params["b2"].reshape(Cout, 1).astype(jnp.float32)
    g1 = params["g1"].reshape(Cout, 1).astype(jnp.float32)
    be1 = params["be1"].reshape(Cout, 1).astype(jnp.float32)
    g2 = params["g2"].reshape(Cout, 1).astype(jnp.float32)
    be2 = params["be2"].reshape(Cout, 1).astype(jnp.float32)
    wt = params["wt"].astype(jnp.float32)
    bt = params["bt"].reshape(Cout, 1).astype(jnp.float32)

    flops = (2 * N * HW * Cout * 9 * (Cin_p + Cout)      # two convs (im2col matmuls)
             + 2 * N * HW * HoWo * Cout                  # pool gather matmul
             + 20 * N * Cout * HW)                       # BN / ReLU / adds / maxes
    bytes_accessed = 4 * (x_flat.size + t_col.size + masks.size + sel.size
                          + w1m.size + w2m.size + 8 * Cout
                          + N * Cout * HW + Cout * N * HoWo)
    cost = pl.CostEstimate(flops=int(flops), transcendentals=int(2 * Cout),
                           bytes_accessed=int(bytes_accessed))

    residual_f, pooled_f = pl.pallas_call(
        functools.partial(_fused_downsample_kernel, N=N, W=W, HW=HW, HoWo=HoWo),
        out_shape=(jax.ShapeDtypeStruct((N, Cout, HW), jnp.float32),     # residual
                   jax.ShapeDtypeStruct((Cout, N * HoWo), jnp.float32)), # pooled, lane-packed
        cost_estimate=cost,
    )(x_flat, t_col, masks, sel, w1m, b1, g1, be1, wt, bt, w2m, b2, g2, be2)

    residual = residual_f.reshape(N, Cout, H, W)                          # free reshape
    pooled = jnp.transpose(pooled_f.reshape(Cout, N, Ho, Wo), (1, 0, 2, 3))
    return residual, pooled


# ----------------------------------------------------------------------------
# Pure-JAX reference (mirrors the PyTorch forward) for verification.
# ----------------------------------------------------------------------------
def reference_forward(x, temb, P):
    def conv(x, w, b):
        out = lax.conv_general_dilated(
            x, w, window_strides=(1, 1), padding=((1, 1), (1, 1)),
            dimension_numbers=("NCHW", "OIHW", "NCHW"))
        return out + b[None, :, None, None]

    def bn_relu(y, g, be):
        mean = y.mean(axis=(0, 2, 3), keepdims=True)
        var = y.var(axis=(0, 2, 3), keepdims=True)  # biased
        yn = (y - mean) * lax.rsqrt(var + BN_EPS)
        return jnp.maximum(yn * g[None, :, None, None] + be[None, :, None, None], 0.0)

    h = bn_relu(conv(x, P["w1"], P["b1"]), P["g1"], P["be1"])
    t = jnp.maximum(temb @ P["wt"].T + P["bt"], 0.0)
    h = h + t[:, :, None, None]
    r = bn_relu(conv(h, P["w2"], P["b2"]), P["g2"], P["be2"])
    p = lax.reduce_window(r, -jnp.inf, lax.max, (1, 1, 2, 2), (1, 1, 2, 2), "VALID")
    return r, p


if __name__ == "__main__":
    N, Cin, Cout, H, W, T = 2, 4, 8, 16, 16, 32

    key = jax.random.PRNGKey(0)
    keys = jax.random.split(key, 12)
    params = {
        "w1": 0.1 * jax.random.normal(keys[0], (Cout, Cin, 3, 3), jnp.float32),
        "b1": 0.1 * jax.random.normal(keys[1], (Cout,), jnp.float32),
        "g1": 1.0 + 0.1 * jax.random.normal(keys[8], (Cout,), jnp.float32),
        "be1": 0.1 * jax.random.normal(keys[9], (Cout,), jnp.float32),
        "wt": 0.1 * jax.random.normal(keys[2], (Cout, T), jnp.float32),
        "bt": 0.1 * jax.random.normal(keys[3], (Cout,), jnp.float32),
        "w2": 0.1 * jax.random.normal(keys[4], (Cout, Cout, 3, 3), jnp.float32),
        "b2": 0.1 * jax.random.normal(keys[5], (Cout,), jnp.float32),
        "g2": 1.0 + 0.1 * jax.random.normal(keys[10], (Cout,), jnp.float32),
        "be2": 0.1 * jax.random.normal(keys[11], (Cout,), jnp.float32),
    }

    x = jax.random.normal(keys[6], (N, Cin, H, W), jnp.float32)      # NCHW, like PyTorch
    time_embeddings = jax.random.normal(keys[7], (N, T), jnp.float32)

    residual, pooled = downsample_block_forward(x, time_embeddings, params)
    jax.block_until_ready((residual, pooled))

    r_ref, p_ref = reference_forward(x, time_embeddings, params)
    np.testing.assert_allclose(np.asarray(residual), np.asarray(r_ref), rtol=1e-3, atol=1e-3)
    np.testing.assert_allclose(np.asarray(pooled), np.asarray(p_ref), rtol=1e-3, atol=1e-3)
    assert residual.shape == (N, Cout, H, W) and pooled.shape == (N, Cout, H // 2, W // 2)

    print("KERNEL_OK")
</pallas_src>

<mosaic_0001>
module attributes {stable_mosaic.version = 11 : i64} {
  func.func @_fused_downsample_kernel(%arg0: memref<2x8x256xf32, #tpu.memory_space<vmem>>, %arg1: memref<2x1x32xf32, #tpu.memory_space<vmem>>, %arg2: memref<9x256xf32, #tpu.memory_space<vmem>>, %arg3: memref<256x64xf32, #tpu.memory_space<vmem>>, %arg4: memref<8x72xf32, #tpu.memory_space<vmem>>, %arg5: memref<8x1xf32, #tpu.memory_space<vmem>>, %arg6: memref<8x1xf32, #tpu.memory_space<vmem>>, %arg7: memref<8x1xf32, #tpu.memory_space<vmem>>, %arg8: memref<8x32xf32, #tpu.memory_space<vmem>>, %arg9: memref<8x1xf32, #tpu.memory_space<vmem>>, %arg10: memref<8x72xf32, #tpu.memory_space<vmem>>, %arg11: memref<8x1xf32, #tpu.memory_space<vmem>>, %arg12: memref<8x1xf32, #tpu.memory_space<vmem>>, %arg13: memref<8x1xf32, #tpu.memory_space<vmem>>, %arg14: memref<2x8x256xf32, #tpu.memory_space<vmem>>, %arg15: memref<8x128xf32, #tpu.memory_space<vmem>>) attributes {dimension_semantics = [], scalar_prefetch = 0 : i64, scratch_operands = 0 : i64, tpu.core_type = #tpu.core_type<tc>} {
    %c0 = arith.constant 0 : index
    %c0_0 = arith.constant 0 : index
    %0 = vector.load %arg2[%c0, %c0_0] : memref<9x256xf32, #tpu.memory_space<vmem>>, vector<9x256xf32>
    %c0_1 = arith.constant 0 : index
    %c0_2 = arith.constant 0 : index
    %c0_3 = arith.constant 0 : index
    %1 = vector.load %arg0[%c0_1, %c0_2, %c0_3] : memref<2x8x256xf32, #tpu.memory_space<vmem>>, vector<1x8x256xf32>
    %2 = vector.shape_cast %1 : vector<1x8x256xf32> to vector<8x256xf32>
    %c17_i32 = arith.constant 17 : i32
    %3 = tpu.dynamic_rotate %2 by %c17_i32 dim 1 : vector<8x256xf32>, i32 -> vector<8x256xf32>
    %4 = vector.extract_strided_slice %0 {offsets = [0, 0], sizes = [1, 256], strides = [1, 1]} : vector<9x256xf32> to vector<1x256xf32>
    %5 = vector.broadcast %4 : vector<1x256xf32> to vector<8x256xf32>
    %6 = arith.mulf %3, %5 : vector<8x256xf32>
    %c16_i32 = arith.constant 16 : i32
    %7 = tpu.dynamic_rotate %2 by %c16_i32 dim 1 : vector<8x256xf32>, i32 -> vector<8x256xf32>
    %8 = vector.extract_strided_slice %0 {offsets = [1, 0], sizes = [1, 256], strides = [1, 1]} : vector<9x256xf32> to vector<1x256xf32>
    %9 = vector.broadcast %8 : vector<1x256xf32> to vector<8x256xf32>
    %10 = arith.mulf %7, %9 : vector<8x256xf32>
    %c15_i32 = arith.constant 15 : i32
    %11 = tpu.dynamic_rotate %2 by %c15_i32 dim 1 : vector<8x256xf32>, i32 -> vector<8x256xf32>
    %12 = vector.extract_strided_slice %0 {offsets = [2, 0], sizes = [1, 256], strides = [1, 1]} : vector<9x256xf32> to vector<1x256xf32>
    %13 = vector.broadcast %12 : vector<1x256xf32> to vector<8x256xf32>
    %14 = arith.mulf %11, %13 : vector<8x256xf32>
    %c1_i32 = arith.constant 1 : i32
    %15 = tpu.dynamic_rotate %2 by %c1_i32 dim 1 : vector<8x256xf32>, i32 -> vector<8x256xf32>
    %16 = vector.extract_strided_slice %0 {offsets = [3, 0], sizes = [1, 256], strides = [1, 1]} : vector<9x256xf32> to vector<1x256xf32>
    %17 = vector.broadcast %16 : vector<1x256xf32> to vector<8x256xf32>
    %18 = arith.mulf %15, %17 : vector<8x256xf32>
    %c255_i32 = arith.constant 255 : i32
    %19 = tpu.dynamic_rotate %2 by %c255_i32 dim 1 : vector<8x256xf32>, i32 -> vector<8x256xf32>
    %20 = vector.extract_strided_slice %0 {offsets = [5, 0], sizes = [1, 256], strides = [1, 1]} : vector<9x256xf32> to vector<1x256xf32>
    %21 = vector.broadcast %20 : vector<1x256xf32> to vector<8x256xf32>
    %22 = arith.mulf %19, %21 : vector<8x256xf32>
    %c241_i32 = arith.constant 241 : i32
    %23 = tpu.dynamic_rotate %2 by %c241_i32 dim 1 : vector<8x256xf32>, i32 -> vector<8x256xf32>
    %24 = vector.extract_strided_slice %0 {offsets = [6, 0], sizes = [1, 256], strides = [1, 1]} : vector<9x256xf32> to vector<1x256xf32>
    %25 = vector.broadcast %24 : vector<1x256xf32> to vector<8x256xf32>
    %26 = arith.mulf %23, %25 : vector<8x256xf32>
    %c240_i32 = arith.constant 240 : i32
    %27 = tpu.dynamic_rotate %2 by %c240_i32 dim 1 : vector<8x256xf32>, i32 -> vector<8x256xf32>
    %28 = vector.extract_strided_slice %0 {offsets = [7, 0], sizes = [1, 256], strides = [1, 1]} : vector<9x256xf32> to vector<1x256xf32>
    %29 = vector.broadcast %28 : vector<1x256xf32> to vector<8x256xf32>
    %30 = arith.mulf %27, %29 : vector<8x256xf32>
    %c239_i32 = arith.constant 239 : i32
    %31 = tpu.dynamic_rotate %2 by %c239_i32 dim 1 : vector<8x256xf32>, i32 -> vector<8x256xf32>
    %32 = vector.extract_strided_slice %0 {offsets = [8, 0], sizes = [1, 256], strides = [1, 1]} : vector<9x256xf32> to vector<1x256xf32>
    %33 = vector.broadcast %32 : vector<1x256xf32> to vector<8x256xf32>
    %34 = arith.mulf %31, %33 : vector<8x256xf32>
    %35 = tpu.concatenate %6, %10, %14, %18, %2, %22, %26, %30, %34 in 0 : vector<8x256xf32>, vector<8x256xf32>, vector<8x256xf32>, vector<8x256xf32>, vector<8x256xf32>, vector<8x256xf32>, vector<8x256xf32>, vector<8x256xf32>, vector<8x256xf32> -> vector<72x256xf32>
    %c0_4 = arith.constant 0 : index
    %c0_5 = arith.constant 0 : index
    %36 = vector.load %arg4[%c0_4, %c0_5] : memref<8x72xf32, #tpu.memory_space<vmem>>, vector<8x72xf32>
    %cst = arith.constant dense<0.000000e+00> : vector<8x256xf32>
    %37 = tpu.matmul %36, %35, %cst {dimension_numbers = #tpu.dot_dimension_numbers<[1], [0], [0], [1], [0, 0, 1, 1], [], []>} : vector<8x72xf32>, vector<72x256xf32>, vector<8x256xf32> -> vector<8x256xf32>
    %c0_6 = arith.constant 0 : index
    %c0_7 = arith.constant 0 : index
    %38 = vector.load %arg5[%c0_6, %c0_7] : memref<8x1xf32, #tpu.memory_space<vmem>>, vector<8x1xf32>
    %39 = vector.broadcast %38 : vector<8x1xf32> to vector<8x256xf32>
    %40 = arith.addf %37, %39 : vector<8x256xf32>
    %c1 = arith.constant 1 : index
    %c0_8 = arith.constant 0 : index
    %c0_9 = arith.constant 0 : index
    %41 = vector.load %arg0[%c1, %c0_8, %c0_9] : memref<2x8x256xf32, #tpu.memory_space<vmem>>, vector<1x8x256xf32>
    %42 = vector.shape_cast %41 : vector<1x8x256xf32> to vector<8x256xf32>
    %c17_i32_10 = arith.constant 17 : i32
    %43 = tpu.dynamic_rotate %42 by %c17_i32_10 dim 1 : vector<8x256xf32>, i32 -> vector<8x256xf32>
    %44 = vector.extract_strided_slice %0 {offsets = [0, 0], sizes = [1, 256], strides = [1, 1]} : vector<9x256xf32> to vector<1x256xf32>
    %45 = vector.broadcast %44 : vector<1x256xf32> to vector<8x256xf32>
    %46 = arith.mulf %43, %45 : vector<8x256xf32>
    %c16_i32_11 = arith.constant 16 : i32
    %47 = tpu.dynamic_rotate %42 by %c16_i32_11 dim 1 : vector<8x256xf32>, i32 -> vector<8x256xf32>
    %48 = vector.extract_strided_slice %0 {offsets = [1, 0], sizes = [1, 256], strides = [1, 1]} : vector<9x256xf32> to vector<1x256xf32>
    %49 = vector.broadcast %48 : vector<1x256xf32> to vector<8x256xf32>
    %50 = arith.mulf %47, %49 : vector<8x256xf32>
    %c15_i32_12 = arith.constant 15 : i32
    %51 = tpu.dynamic_rotate %42 by %c15_i32_12 dim 1 : vector<8x256xf32>, i32 -> vector<8x256xf32>
    %52 = vector.extract_strided_slice %0 {offsets = [2, 0], sizes = [1, 256], strides = [1, 1]} : vector<9x256xf32> to vector<1x256xf32>
    %53 = vector.broadcast %52 : vector<1x256xf32> to vector<8x256xf32>
    %54 = arith.mulf %51, %53 : vector<8x256xf32>
    %c1_i32_13 = arith.constant 1 : i32
    %55 = tpu.dynamic_rotate %42 by %c1_i32_13 dim 1 : vector<8x256xf32>, i32 -> vector<8x256xf32>
    %56 = vector.extract_strided_slice %0 {offsets = [3, 0], sizes = [1, 256], strides = [1, 1]} : vector<9x256xf32> to vector<1x256xf32>
    %57 = vector.broadcast %56 : vector<1x256xf32> to vector<8x256xf32>
    %58 = arith.mulf %55, %57 : vector<8x256xf32>
    %c255_i32_14 = arith.constant 255 : i32
    %59 = tpu.dynamic_rotate %42 by %c255_i32_14 dim 1 : vector<8x256xf32>, i32 -> vector<8x256xf32>
    %60 = vector.extract_strided_slice %0 {offsets = [5, 0], sizes = [1, 256], strides = [1, 1]} : vector<9x256xf32> to vector<1x256xf32>
    %61 = vector.broadcast %60 : vector<1x256xf32> to vector<8x256xf32>
    %62 = arith.mulf %59, %61 : vector<8x256xf32>
    %c241_i32_15 = arith.constant 241 : i32
    %63 = tpu.dynamic_rotate %42 by %c241_i32_15 dim 1 : vector<8x256xf32>, i32 -> vector<8x256xf32>
    %64 = vector.extract_strided_slice %0 {offsets = [6, 0], sizes = [1, 256], strides = [1, 1]} : vector<9x256xf32> to vector<1x256xf32>
    %65 = vector.broadcast %64 : vector<1x256xf32> to vector<8x256xf32>
    %66 = arith.mulf %63, %65 : vector<8x256xf32>
    %c240_i32_16 = arith.constant 240 : i32
    %67 = tpu.dynamic_rotate %42 by %c240_i32_16 dim 1 : vector<8x256xf32>, i32 -> vector<8x256xf32>
    %68 = vector.extract_strided_slice %0 {offsets = [7, 0], sizes = [1, 256], strides = [1, 1]} : vector<9x256xf32> to vector<1x256xf32>
    %69 = vector.broadcast %68 : vector<1x256xf32> to vector<8x256xf32>
    %70 = arith.mulf %67, %69 : vector<8x256xf32>
    %c239_i32_17 = arith.constant 239 : i32
    %71 = tpu.dynamic_rotate %42 by %c239_i32_17 dim 1 : vector<8x256xf32>, i32 -> vector<8x256xf32>
    %72 = vector.extract_strided_slice %0 {offsets = [8, 0], sizes = [1, 256], strides = [1, 1]} : vector<9x256xf32> to vector<1x256xf32>
    %73 = vector.broadcast %72 : vector<1x256xf32> to vector<8x256xf32>
    %74 = arith.mulf %71, %73 : vector<8x256xf32>
    %75 = tpu.concatenate %46, %50, %54, %58, %42, %62, %66, %70, %74 in 0 : vector<8x256xf32>, vector<8x256xf32>, vector<8x256xf32>, vector<8x256xf32>, vector<8x256xf32>, vector<8x256xf32>, vector<8x256xf32>, vector<8x256xf32>, vector<8x256xf32> -> vector<72x256xf32>
    %c0_18 = arith.constant 0 : index
    %c0_19 = arith.constant 0 : index
    %76 = vector.load %arg4[%c0_18, %c0_19] : memref<8x72xf32, #tpu.memory_space<vmem>>, vector<8x72xf32>
    %cst_20 = arith.constant dense<0.000000e+00> : vector<8x256xf32>
    %77 = tpu.matmul %76, %75, %cst_20 {dimension_numbers = #tpu.dot_dimension_numbers<[1], [0], [0], [1], [0, 0, 1, 1], [], []>} : vector<8x72xf32>, vector<72x256xf32>, vector<8x256xf32> -> vector<8x256xf32>
    %c0_21 = arith.constant 0 : index
    %c0_22 = arith.constant 0 : index
    %78 = vector.load %arg5[%c0_21, %c0_22] : memref<8x1xf32, #tpu.memory_space<vmem>>, vector<8x1xf32>
    %79 = vector.broadcast %78 : vector<8x1xf32> to vector<8x256xf32>
    %80 = arith.addf %77, %79 : vector<8x256xf32>
    %cst_23 = arith.constant dense<0.000000e+00> : vector<8xf32>
    %81 = vector.multi_reduction <add>, %40, %cst_23 [1] : vector<8x256xf32> to vector<8xf32>
    %82 = vector.shape_cast %81 : vector<8xf32> to vector<8x1xf32>
    %cst_24 = arith.constant 0.000000e+00 : f32
    %83 = vector.broadcast %cst_24 : f32 to vector<8x1xf32>
    %84 = arith.addf %83, %82 : vector<8x1xf32>
    %cst_25 = arith.constant dense<0.000000e+00> : vector<8xf32>
    %85 = vector.multi_reduction <add>, %80, %cst_25 [1] : vector<8x256xf32> to vector<8xf32>
    %86 = vector.shape_cast %85 : vector<8xf32> to vector<8x1xf32>
    %87 = arith.addf %84, %86 : vector<8x1xf32>
    %88 = arith.mulf %40, %40 : vector<8x256xf32>
    %cst_26 = arith.constant dense<0.000000e+00> : vector<8xf32>
    %89 = vector.multi_reduction <add>, %88, %cst_26 [1] : vector<8x256xf32> to vector<8xf32>
    %90 = vector.shape_cast %89 : vector<8xf32> to vector<8x1xf32>
    %cst_27 = arith.constant 0.000000e+00 : f32
    %91 = vector.broadcast %cst_27 : f32 to vector<8x1xf32>
    %92 = arith.addf %91, %90 : vector<8x1xf32>
    %93 = arith.mulf %80, %80 : vector<8x256xf32>
    %cst_28 = arith.constant dense<0.000000e+00> : vector<8xf32>
    %94 = vector.multi_reduction <add>, %93, %cst_28 [1] : vector<8x256xf32> to vector<8xf32>
    %95 = vector.shape_cast %94 : vector<8xf32> to vector<8x1xf32>
    %96 = arith.addf %92, %95 : vector<8x1xf32>
    %cst_29 = arith.constant 0.001953125 : f32
    %97 = vector.broadcast %cst_29 : f32 to vector<8x1xf32>
    %98 = arith.mulf %87, %97 : vector<8x1xf32>
    %cst_30 = arith.constant 0.001953125 : f32
    %99 = vector.broadcast %cst_30 : f32 to vector<8x1xf32>
    %100 = arith.mulf %96, %99 : vector<8x1xf32>
    %101 = arith.mulf %98, %98 : vector<8x1xf32>
    %102 = arith.subf %100, %101 : vector<8x1xf32>
    %c0_31 = arith.constant 0 : index
    %c0_32 = arith.constant 0 : index
    %103 = vector.load %arg6[%c0_31, %c0_32] : memref<8x1xf32, #tpu.memory_space<vmem>>, vector<8x1xf32>
    %cst_33 = arith.constant 9.99999974E-6 : f32
    %104 = vector.broadcast %cst_33 : f32 to vector<8x1xf32>
    %105 = arith.addf %102, %104 : vector<8x1xf32>
    %106 = math.rsqrt %105 : vector<8x1xf32>
    %107 = arith.mulf %103, %106 : vector<8x1xf32>
    %c0_34 = arith.constant 0 : index
    %c0_35 = arith.constant 0 : index
    %108 = vector.load %arg7[%c0_34, %c0_35] : memref<8x1xf32, #tpu.memory_space<vmem>>, vector<8x1xf32>
    %109 = arith.mulf %98, %107 : vector<8x1xf32>
    %110 = arith.subf %108, %109 : vector<8x1xf32>
    %c0_36 = arith.constant 0 : index
    %c0_37 = arith.constant 0 : index
    %111 = vector.load %arg8[%c0_36, %c0_37] : memref<8x32xf32, #tpu.memory_space<vmem>>, vector<8x32xf32>
    %c0_38 = arith.constant 0 : index
    %c0_39 = arith.constant 0 : index
    %c0_40 = arith.constant 0 : index
    %112 = vector.load %arg1[%c0_38, %c0_39, %c0_40] : memref<2x1x32xf32, #tpu.memory_space<vmem>>, vector<1x1x32xf32>
    %113 = vector.shape_cast %112 : vector<1x1x32xf32> to vector<1x32xf32>
    %114 = vector.broadcast %113 : vector<1x32xf32> to vector<8x32xf32>
    %115 = arith.mulf %111, %114 : vector<8x32xf32>
    %cst_41 = arith.constant dense<0.000000e+00> : vector<8xf32>
    %116 = vector.multi_reduction <add>, %115, %cst_41 [1] : vector<8x32xf32> to vector<8xf32>
    %117 = vector.shape_cast %116 : vector<8xf32> to vector<8x1xf32>
    %c0_42 = arith.constant 0 : index
    %c0_43 = arith.constant 0 : index
    %118 = vector.load %arg9[%c0_42, %c0_43] : memref<8x1xf32, #tpu.memory_space<vmem>>, vector<8x1xf32>
    %119 = arith.addf %117, %118 : vector<8x1xf32>
    %cst_44 = arith.constant 0.000000e+00 : f32
    %120 = vector.broadcast %cst_44 : f32 to vector<8x1xf32>
    %121 = arith.maximumf %119, %120 : vector<8x1xf32>
    %122 = vector.broadcast %107 : vector<8x1xf32> to vector<8x256xf32>
    %123 = arith.mulf %40, %122 : vector<8x256xf32>
    %124 = vector.broadcast %110 : vector<8x1xf32> to vector<8x256xf32>
    %125 = arith.addf %123, %124 : vector<8x256xf32>
    %cst_45 = arith.constant 0.000000e+00 : f32
    %126 = vector.broadcast %cst_45 : f32 to vector<8x256xf32>
    %127 = arith.maximumf %125, %126 : vector<8x256xf32>
    %128 = vector.broadcast %121 : vector<8x1xf32> to vector<8x256xf32>
    %129 = arith.addf %127, %128 : vector<8x256xf32>
    %c17_i32_46 = arith.constant 17 : i32
    %130 = tpu.dynamic_rotate %129 by %c17_i32_46 dim 1 : vector<8x256xf32>, i32 -> vector<8x256xf32>
    %131 = vector.extract_strided_slice %0 {offsets = [0, 0], sizes = [1, 256], strides = [1, 1]} : vector<9x256xf32> to vector<1x256xf32>
    %132 = vector.broadcast %131 : vector<1x256xf32> to vector<8x256xf32>
    %133 = arith.mulf %130, %132 : vector<8x256xf32>
    %c16_i32_47 = arith.constant 16 : i32
    %134 = tpu.dynamic_rotate %129 by %c16_i32_47 dim 1 : vector<8x256xf32>, i32 -> vector<8x256xf32>
    %135 = vector.extract_strided_slice %0 {offsets = [1, 0], sizes = [1, 256], strides = [1, 1]} : vector<9x256xf32> to vector<1x256xf32>
    %136 = vector.broadcast %135 : vector<1x256xf32> to vector<8x256xf32>
    %137 = arith.mulf %134, %136 : vector<8x256xf32>
    %c15_i32_48 = arith.constant 15 : i32
    %138 = tpu.dynamic_rotate %129 by %c15_i32_48 dim 1 : vector<8x256xf32>, i32 -> vector<8x256xf32>
    %139 = vector.extract_strided_slice %0 {offsets = [2, 0], sizes = [1, 256], strides = [1, 1]} : vector<9x256xf32> to vector<1x256xf32>
    %140 = vector.broadcast %139 : vector<1x256xf32> to vector<8x256xf32>
    %141 = arith.mulf %138, %140 : vector<8x256xf32>
    %c1_i32_49 = arith.constant 1 : i32
    %142 = tpu.dynamic_rotate %129 by %c1_i32_49 dim 1 : vector<8x256xf32>, i32 -> vector<8x256xf32>
    %143 = vector.extract_strided_slice %0 {offsets = [3, 0], sizes = [1, 256], strides = [1, 1]} : vector<9x256xf32> to vector<1x256xf32>
    %144 = vector.broadcast %143 : vector<1x256xf32> to vector<8x256xf32>
    %145 = arith.mulf %142, %144 : vector<8x256xf32>
    %c255_i32_50 = arith.constant 255 : i32
    %146 = tpu.dynamic_rotate %129 by %c255_i32_50 dim 1 : vector<8x256xf32>, i32 -> vector<8x256xf32>
    %147 = vector.extract_strided_slice %0 {offsets = [5, 0], sizes = [1, 256], strides = [1, 1]} : vector<9x256xf32> to vector<1x256xf32>
    %148 = vector.broadcast %147 : vector<1x256xf32> to vector<8x256xf32>
    %149 = arith.mulf %146, %148 : vector<8x256xf32>
    %c241_i32_51 = arith.constant 241 : i32
    %150 = tpu.dynamic_rotate %129 by %c241_i32_51 dim 1 : vector<8x256xf32>, i32 -> vector<8x256xf32>
    %151 = vector.extract_strided_slice %0 {offsets = [6, 0], sizes = [1, 256], strides = [1, 1]} : vector<9x256xf32> to vector<1x256xf32>
    %152 = vector.broadcast %151 : vector<1x256xf32> to vector<8x256xf32>
    %153 = arith.mulf %150, %152 : vector<8x256xf32>
    %c240_i32_52 = arith.constant 240 : i32
    %154 = tpu.dynamic_rotate %129 by %c240_i32_52 dim 1 : vector<8x256xf32>, i32 -> vector<8x256xf32>
    %155 = vector.extract_strided_slice %0 {offsets = [7, 0], sizes = [1, 256], strides = [1, 1]} : vector<9x256xf32> to vector<1x256xf32>
    %156 = vector.broadcast %155 : vector<1x256xf32> to vector<8x256xf32>
    %157 = arith.mulf %154, %156 : vector<8x256xf32>
    %c239_i32_53 = arith.constant 239 : i32
    %158 = tpu.dynamic_rotate %129 by %c239_i32_53 dim 1 : vector<8x256xf32>, i32 -> vector<8x256xf32>
    %159 = vector.extract_strided_slice %0 {offsets = [8, 0], sizes = [1, 256], strides = [1, 1]} : vector<9x256xf32> to vector<1x256xf32>
    %160 = vector.broadcast %159 : vector<1x256xf32> to vector<8x256xf32>
    %161 = arith.mulf %158, %160 : vector<8x256xf32>
    %162 = tpu.concatenate %133, %137, %141, %145, %129, %149, %153, %157, %161 in 0 : vector<8x256xf32>, vector<8x256xf32>, vector<8x256xf32>, vector<8x256xf32>, vector<8x256xf32>, vector<8x256xf32>, vector<8x256xf32>, vector<8x256xf32>, vector<8x256xf32> -> vector<72x256xf32>
    %c0_54 = arith.constant 0 : index
    %c0_55 = arith.constant 0 : index
    %163 = vector.load %arg10[%c0_54, %c0_55] : memref<8x72xf32, #tpu.memory_space<vmem>>, vector<8x72xf32>
    %cst_56 = arith.constant dense<0.000000e+00> : vector<8x256xf32>
    %164 = tpu.matmul %163, %162, %cst_56 {dimension_numbers = #tpu.dot_dimension_numbers<[1], [0], [0], [1], [0, 0, 1, 1], [], []>} : vector<8x72xf32>, vector<72x256xf32>, vector<8x256xf32> -> vector<8x256xf32>
    %c0_57 = arith.constant 0 : index
    %c0_58 = arith.constant 0 : index
    %165 = vector.load %arg11[%c0_57, %c0_58] : memref<8x1xf32, #tpu.memory_space<vmem>>, vector<8x1xf32>
    %166 = vector.broadcast %165 : vector<8x1xf32> to vector<8x256xf32>
    %167 = arith.addf %164, %166 : vector<8x256xf32>
    %c0_59 = arith.constant 0 : index
    %c0_60 = arith.constant 0 : index
    %168 = vector.load %arg8[%c0_59, %c0_60] : memref<8x32xf32, #tpu.memory_space<vmem>>, vector<8x32xf32>
    %c1_61 = arith.constant 1 : index
    %c0_62 = arith.constant 0 : index
    %c0_63 = arith.constant 0 : index
    %169 = vector.load %arg1[%c1_61, %c0_62, %c0_63] : memref<2x1x32xf32, #tpu.memory_space<vmem>>, vector<1x1x32xf32>
    %170 = vector.shape_cast %169 : vector<1x1x32xf32> to vector<1x32xf32>
    %171 = vector.broadcast %170 : vector<1x32xf32> to vector<8x32xf32>
    %172 = arith.mulf %168, %171 : vector<8x32xf32>
    %cst_64 = arith.constant dense<0.000000e+00> : vector<8xf32>
    %173 = vector.multi_reduction <add>, %172, %cst_64 [1] : vector<8x32xf32> to vector<8xf32>
    %174 = vector.shape_cast %173 : vector<8xf32> to vector<8x1xf32>
    %c0_65 = arith.constant 0 : index
    %c0_66 = arith.constant 0 : index
    %175 = vector.load %arg9[%c0_65, %c0_66] : memref<8x1xf32, #tpu.memory_space<vmem>>, vector<8x1xf32>
    %176 = arith.addf %174, %175 : vector<8x1xf32>
    %cst_67 = arith.constant 0.000000e+00 : f32
    %177 = vector.broadcast %cst_67 : f32 to vector<8x1xf32>
    %178 = arith.maximumf %176, %177 : vector<8x1xf32>
    %179 = vector.broadcast %107 : vector<8x1xf32> to vector<8x256xf32>
    %180 = arith.mulf %80, %179 : vector<8x256xf32>
    %181 = vector.broadcast %110 : vector<8x1xf32> to vector<8x256xf32>
    %182 = arith.addf %180, %181 : vector<8x256xf32>
    %cst_68 = arith.constant 0.000000e+00 : f32
    %183 = vector.broadcast %cst_68 : f32 to vector<8x256xf32>
    %184 = arith.maximumf %182, %183 : vector<8x256xf32>
    %185 = vector.broadcast %178 : vector<8x1xf32> to vector<8x256xf32>
    %186 = arith.addf %184, %185 : vector<8x256xf32>
    %c17_i32_69 = arith.constant 17 : i32
    %187 = tpu.dynamic_rotate %186 by %c17_i32_69 dim 1 : vector<8x256xf32>, i32 -> vector<8x256xf32>
    %188 = vector.extract_strided_slice %0 {offsets = [0, 0], sizes = [1, 256], strides = [1, 1]} : vector<9x256xf32> to vector<1x256xf32>
    %189 = vector.broadcast %188 : vector<1x256xf32> to vector<8x256xf32>
    %190 = arith.mulf %187, %189 : vector<8x256xf32>
    %c16_i32_70 = arith.constant 16 : i32
    %191 = tpu.dynamic_rotate %186 by %c16_i32_70 dim 1 : vector<8x256xf32>, i32 -> vector<8x256xf32>
    %192 = vector.extract_strided_slice %0 {offsets = [1, 0], sizes = [1, 256], strides = [1, 1]} : vector<9x256xf32> to vector<1x256xf32>
    %193 = vector.broadcast %192 : vector<1x256xf32> to vector<8x256xf32>
    %194 = arith.mulf %191, %193 : vector<8x256xf32>
    %c15_i32_71 = arith.constant 15 : i32
    %195 = tpu.dynamic_rotate %186 by %c15_i32_71 dim 1 : vector<8x256xf32>, i32 -> vector<8x256xf32>
    %196 = vector.extract_strided_slice %0 {offsets = [2, 0], sizes = [1, 256], strides = [1, 1]} : vector<9x256xf32> to vector<1x256xf32>
    %197 = vector.broadcast %196 : vector<1x256xf32> to vector<8x256xf32>
    %198 = arith.mulf %195, %197 : vector<8x256xf32>
    %c1_i32_72 = arith.constant 1 : i32
    %199 = tpu.dynamic_rotate %186 by %c1_i32_72 dim 1 : vector<8x256xf32>, i32 -> vector<8x256xf32>
    %200 = vector.extract_strided_slice %0 {offsets = [3, 0], sizes = [1, 256], strides = [1, 1]} : vector<9x256xf32> to vector<1x256xf32>
    %201 = vector.broadcast %200 : vector<1x256xf32> to vector<8x256xf32>
    %202 = arith.mulf %199, %201 : vector<8x256xf32>
    %c255_i32_73 = arith.constant 255 : i32
    %203 = tpu.dynamic_rotate %186 by %c255_i32_73 dim 1 : vector<8x256xf32>, i32 -> vector<8x256xf32>
    %204 = vector.extract_strided_slice %0 {offsets = [5, 0], sizes = [1, 256], strides = [1, 1]} : vector<9x256xf32> to vector<1x256xf32>
    %205 = vector.broadcast %204 : vector<1x256xf32> to vector<8x256xf32>
    %206 = arith.mulf %203, %205 : vector<8x256xf32>
    %c241_i32_74 = arith.constant 241 : i32
    %207 = tpu.dynamic_rotate %186 by %c241_i32_74 dim 1 : vector<8x256xf32>, i32 -> vector<8x256xf32>
    %208 = vector.extract_strided_slice %0 {offsets = [6, 0], sizes = [1, 256], strides = [1, 1]} : vector<9x256xf32> to vector<1x256xf32>
    %209 = vector.broadcast %208 : vector<1x256xf32> to vector<8x256xf32>
    %210 = arith.mulf %207, %209 : vector<8x256xf32>
    %c240_i32_75 = arith.constant 240 : i32
    %211 = tpu.dynamic_rotate %186 by %c240_i32_75 dim 1 : vector<8x256xf32>, i32 -> vector<8x256xf32>
    %212 = vector.extract_strided_slice %0 {offsets = [7, 0], sizes = [1, 256], strides = [1, 1]} : vector<9x256xf32> to vector<1x256xf32>
    %213 = vector.broadcast %212 : vector<1x256xf32> to vector<8x256xf32>
    %214 = arith.mulf %211, %213 : vector<8x256xf32>
    %c239_i32_76 = arith.constant 239 : i32
    %215 = tpu.dynamic_rotate %186 by %c239_i32_76 dim 1 : vector<8x256xf32>, i32 -> vector<8x256xf32>
    %216 = vector.extract_strided_slice %0 {offsets = [8, 0], sizes = [1, 256], strides = [1, 1]} : vector<9x256xf32> to vector<1x256xf32>
    %217 = vector.broadcast %216 : vector<1x256xf32> to vector<8x256xf32>
    %218 = arith.mulf %215, %217 : vector<8x256xf32>
    %219 = tpu.concatenate %190, %194, %198, %202, %186, %206, %210, %214, %218 in 0 : vector<8x256xf32>, vector<8x256xf32>, vector<8x256xf32>, vector<8x256xf32>, vector<8x256xf32>, vector<8x256xf32>, vector<8x256xf32>, vector<8x256xf32>, vector<8x256xf32> -> vector<72x256xf32>
    %c0_77 = arith.constant 0 : index
    %c0_78 = arith.constant 0 : index
    %220 = vector.load %arg10[%c0_77, %c0_78] : memref<8x72xf32, #tpu.memory_space<vmem>>, vector<8x72xf32>
    %cst_79 = arith.constant dense<0.000000e+00> : vector<8x256xf32>
    %221 = tpu.matmul %220, %219, %cst_79 {dimension_numbers = #tpu.dot_dimension_numbers<[1], [0], [0], [1], [0, 0, 1, 1], [], []>} : vector<8x72xf32>, vector<72x256xf32>, vector<8x256xf32> -> vector<8x256xf32>
    %c0_80 = arith.constant 0 : index
    %c0_81 = arith.constant 0 : index
    %222 = vector.load %arg11[%c0_80, %c0_81] : memref<8x1xf32, #tpu.memory_space<vmem>>, vector<8x1xf32>
    %223 = vector.broadcast %222 : vector<8x1xf32> to vector<8x256xf32>
    %224 = arith.addf %221, %223 : vector<8x256xf32>
    %cst_82 = arith.constant dense<0.000000e+00> : vector<8xf32>
    %225 = vector.multi_reduction <add>, %167, %cst_82 [1] : vector<8x256xf32> to vector<8xf32>
    %226 = vector.shape_cast %225 : vector<8xf32> to vector<8x1xf32>
    %cst_83 = arith.constant 0.000000e+00 : f32
    %227 = vector.broadcast %cst_83 : f32 to vector<8x1xf32>
    %228 = arith.addf %227, %226 : vector<8x1xf32>
    %cst_84 = arith.constant dense<0.000000e+00> : vector<8xf32>
    %229 = vector.multi_reduction <add>, %224, %cst_84 [1] : vector<8x256xf32> to vector<8xf32>
    %230 = vector.shape_cast %229 : vector<8xf32> to vector<8x1xf32>
    %231 = arith.addf %228, %230 : vector<8x1xf32>
    %232 = arith.mulf %167, %167 : vector<8x256xf32>
    %cst_85 = arith.constant dense<0.000000e+00> : vector<8xf32>
    %233 = vector.multi_reduction <add>, %232, %cst_85 [1] : vector<8x256xf32> to vector<8xf32>
    %234 = vector.shape_cast %233 : vector<8xf32> to vector<8x1xf32>
    %cst_86 = arith.constant 0.000000e+00 : f32
    %235 = vector.broadcast %cst_86 : f32 to vector<8x1xf32>
    %236 = arith.addf %235, %234 : vector<8x1xf32>
    %237 = arith.mulf %224, %224 : vector<8x256xf32>
    %cst_87 = arith.constant dense<0.000000e+00> : vector<8xf32>
    %238 = vector.multi_reduction <add>, %237, %cst_87 [1] : vector<8x256xf32> to vector<8xf32>
    %239 = vector.shape_cast %238 : vector<8xf32> to vector<8x1xf32>
    %240 = arith.addf %236, %239 : vector<8x1xf32>
    %cst_88 = arith.constant 0.001953125 : f32
    %241 = vector.broadcast %cst_88 : f32 to vector<8x1xf32>
    %242 = arith.mulf %231, %241 : vector<8x1xf32>
    %cst_89 = arith.constant 0.001953125 : f32
    %243 = vector.broadcast %cst_89 : f32 to vector<8x1xf32>
    %244 = arith.mulf %240, %243 : vector<8x1xf32>
    %245 = arith.mulf %242, %242 : vector<8x1xf32>
    %246 = arith.subf %244, %245 : vector<8x1xf32>
    %c0_90 = arith.constant 0 : index
    %c0_91 = arith.constant 0 : index
    %247 = vector.load %arg12[%c0_90, %c0_91] : memref<8x1xf32, #tpu.memory_space<vmem>>, vector<8x1xf32>
    %cst_92 = arith.constant 9.99999974E-6 : f32
    %248 = vector.broadcast %cst_92 : f32 to vector<8x1xf32>
    %249 = arith.addf %246, %248 : vector<8x1xf32>
    %250 = math.rsqrt %249 : vector<8x1xf32>
    %251 = arith.mulf %247, %250 : vector<8x1xf32>
    %c0_93 = arith.constant 0 : index
    %c0_94 = arith.constant 0 : index
    %252 = vector.load %arg13[%c0_93, %c0_94] : memref<8x1xf32, #tpu.memory_space<vmem>>, vector<8x1xf32>
    %253 = arith.mulf %242, %251 : vector<8x1xf32>
    %254 = arith.subf %252, %253 : vector<8x1xf32>
    %c0_95 = arith.constant 0 : index
    %c0_96 = arith.constant 0 : index
    %255 = vector.load %arg3[%c0_95, %c0_96] : memref<256x64xf32, #tpu.memory_space<vmem>>, vector<256x64xf32>
    %256 = vector.broadcast %251 : vector<8x1xf32> to vector<8x256xf32>
    %257 = arith.mulf %167, %256 : vector<8x256xf32>
    %258 = vector.broadcast %254 : vector<8x1xf32> to vector<8x256xf32>
    %259 = arith.addf %257, %258 : vector<8x256xf32>
    %cst_97 = arith.constant 0.000000e+00 : f32
    %260 = vector.broadcast %cst_97 : f32 to vector<8x256xf32>
    %261 = arith.maximumf %259, %260 : vector<8x256xf32>
    %c0_98 = arith.constant 0 : index
    %c0_99 = arith.constant 0 : index
    %c0_100 = arith.constant 0 : index
    %262 = vector.load %arg14[%c0_98, %c0_99, %c0_100] : memref<2x8x256xf32, #tpu.memory_space<vmem>>, vector<1x8x256xf32>
    %263 = vector.shape_cast %262 : vector<1x8x256xf32> to vector<8x256xf32>
    %264 = vector.shape_cast %261 : vector<8x256xf32> to vector<1x8x256xf32>
    tpu.vector_store %arg14[%c0_98, %c0_99, %c0_100], %264 {strides = array<i32>} : memref<2x8x256xf32, #tpu.memory_space<vmem>>, vector<1x8x256xf32>,
    %c255_i32_101 = arith.constant 255 : i32
    %265 = tpu.dynamic_rotate %261 by %c255_i32_101 dim 1 : vector<8x256xf32>, i32 -> vector<8x256xf32>
    %266 = arith.maximumf %261, %265 : vector<8x256xf32>
    %c240_i32_102 = arith.constant 240 : i32
    %267 = tpu.dynamic_rotate %266 by %c240_i32_102 dim 1 : vector<8x256xf32>, i32 -> vector<8x256xf32>
    %268 = arith.maximumf %266, %267 : vector<8x256xf32>
    %cst_103 = arith.constant dense<0.000000e+00> : vector<8x64xf32>
    %269 = tpu.matmul %268, %255, %cst_103 {dimension_numbers = #tpu.dot_dimension_numbers<[1], [0], [0], [1], [0, 0, 1, 1], [], []>} : vector<8x256xf32>, vector<256x64xf32>, vector<8x64xf32> -> vector<8x64xf32>
    %c0_104 = arith.constant 0 : index
    %c0_105 = arith.constant 0 : index
    %270 = vector.load %arg15[%c0_104, %c0_105] : memref<8x128xf32, #tpu.memory_space<vmem>>, vector<8x64xf32>
    tpu.vector_store %arg15[%c0_104, %c0_105], %269 {strides = array<i32>} : memref<8x128xf32, #tpu.memory_space<vmem>>, vector<8x64xf32>,
    %271 = vector.broadcast %251 : vector<8x1xf32> to vector<8x256xf32>
    %272 = arith.mulf %224, %271 : vector<8x256xf32>
    %273 = vector.broadcast %254 : vector<8x1xf32> to vector<8x256xf32>
    %274 = arith.addf %272, %273 : vector<8x256xf32>
    %cst_106 = arith.constant 0.000000e+00 : f32
    %275 = vector.broadcast %cst_106 : f32 to vector<8x256xf32>
    %276 = arith.maximumf %274, %275 : vector<8x256xf32>
    %c1_107 = arith.constant 1 : index
    %c0_108 = arith.constant 0 : index
    %c0_109 = arith.constant 0 : index
    %277 = vector.load %arg14[%c1_107, %c0_108, %c0_109] : memref<2x8x256xf32, #tpu.memory_space<vmem>>, vector<1x8x256xf32>
    %278 = vector.shape_cast %277 : vector<1x8x256xf32> to vector<8x256xf32>
    %279 = vector.shape_cast %276 : vector<8x256xf32> to vector<1x8x256xf32>
    tpu.vector_store %arg14[%c1_107, %c0_108, %c0_109], %279 {strides = array<i32>} : memref<2x8x256xf32, #tpu.memory_space<vmem>>, vector<1x8x256xf32>,
    %c255_i32_110 = arith.constant 255 : i32
    %280 = tpu.dynamic_rotate %276 by %c255_i32_110 dim 1 : vector<8x256xf32>, i32 -> vector<8x256xf32>
    %281 = arith.maximumf %276, %280 : vector<8x256xf32>
    %c240_i32_111 = arith.constant 240 : i32
    %282 = tpu.dynamic_rotate %281 by %c240_i32_111 dim 1 : vector<8x256xf32>, i32 -> vector<8x256xf32>
    %283 = arith.maximumf %281, %282 : vector<8x256xf32>
    %cst_112 = arith.constant dense<0.000000e+00> : vector<8x64xf32>
    %284 = tpu.matmul %283, %255, %cst_112 {dimension_numbers = #tpu.dot_dimension_numbers<[1], [0], [0], [1], [0, 0, 1, 1], [], []>} : vector<8x256xf32>, vector<256x64xf32>, vector<8x64xf32> -> vector<8x64xf32>
    %c0_113 = arith.constant 0 : index
    %c64 = arith.constant 64 : index
    %285 = vector.load %arg15[%c0_113, %c64] : memref<8x128xf32, #tpu.memory_space<vmem>>, vector<8x64xf32>
    tpu.vector_store %arg15[%c0_113, %c64], %284 {strides = array<i32>} : memref<8x128xf32, #tpu.memory_space<vmem>>, vector<8x64xf32>,
    return
  }
}

</mosaic_0001>

<bundles_post_ra>
// kernel: downsample_block_forward.1
= control target key start
LH: loop header
LB: loop body
LE: loop exit
PB: predicated region body
PF: predicated region fallthrough
CT: control target
= control target key end

     0   :  { %s1316_s20 = smov 16   ;;  %s1317_s21 = smov 17   ;;  %v1323_v4 = vmov 0.0   ;;  %v1324_v5 = vmov 0   ;;  %v59_v7 = vlaneseq  ;;  %vm200_vm8 = vcmask 588800   ;;  %s2048_s0 = inlined_call_operand.vmem [shape: f32[2,8,256], index: 0, kind: input, shape index: {}]   ;;  %s2049_s5 = inlined_call_operand.vmem [shape: f32[8,1], index: 5, kind: input, shape index: {}]   ;;  %s2050_s2 = inlined_call_operand.vmem [shape: f32[9,256], index: 2, kind: input, shape index: {}]   ;;  %s2051_s4 = inlined_call_operand.vmem [shape: f32[8,72], index: 4, kind: input, shape index: {}]   ;;  %s2052_s1 = inlined_call_operand.vmem [shape: f32[2,1,32], index: 1, kind: input, shape index: {}]   ;;  %s2053_s8 = inlined_call_operand.vmem [shape: f32[8,32], index: 8, kind: input, shape index: {}]   ;;  %s2054_s9 = inlined_call_operand.vmem [shape: f32[8,1], index: 9, kind: input, shape index: {}]   ;;  %s2055_s6 = inlined_call_operand.vmem [shape: f32[8,1], index: 6, kind: input, shape index: {}]   ;;  %s2056_s7 = inlined_call_operand.vmem [shape: f32[8,1], index: 7, kind: input, shape index: {}]   ;;  %s2057_s11 = inlined_call_operand.vmem [shape: f32[8,1], index: 11, kind: input, shape index: {}]   ;;  %s2058_s10 = inlined_call_operand.vmem [shape: f32[8,72], index: 10, kind: input, shape index: {}]   ;;  %s2059_s12 = inlined_call_operand.vmem [shape: f32[8,1], index: 12, kind: input, shape index: {}]   ;;  %s2060_s13 = inlined_call_operand.vmem [shape: f32[8,1], index: 13, kind: input, shape index: {}]   ;;  %s2061_s3 = inlined_call_operand.vmem [shape: f32[256,64], index: 3, kind: input, shape index: {}]   ;;  %s2062_s14 = inlined_call_operand.vmem [shape: f32[2,8,256], index: 14, kind: output, shape index: {0}]   ;;  %s2063_s15 = inlined_call_operand.vmem [shape: f32[8,128], index: 15, kind: output, shape index: {1}]  }
   0x1   :  { %v1410_v0 = vld [vmem:[%s2048_s0] sm:$0xff]  ;;  %v1419_v1 = vld [vmem:[%s2048_s0 + $0x8] sm:$0xff]  ;;  %v1428_v2 = vld [vmem:[%s2048_s0 + $0x18] sm:$0xff]  ;;  %s1318_s28 = smov 15   ;;  %s1320_s29 = smov 127   ;;  %268 = vmatprep.mubr.f32.mxu0 %v1323_v4  ;;  %406 = vmatprep.mubr.f32.mxu1 %v1323_v4  ;;  %vm453_vm9 = vcmask 261120  }
   0x2   :  { %74 = vrot.lane.b32.xlu1 %v1410_v0, %s1316_s20  ;;  %55 = vrot.lane.b32.xlu0 %v1410_v0, %s1317_s21  ;;  %v1433_v3 = vld [vmem:[%s2048_s0 + $0x10] sm:$0xff]  ;;  %s1319_s0 = smov 1   ;;  %s1321_s30 = smov 113   ;;  %v194_v6 = vld [vmem:[%s2049_s5] sm:$0xff]  ;;  %v1496_v8 = vshrl.u32 %v59_v7, 7  ;;  %v1498_v9 = vand.u32 127, %v59_v7 }
   0x3   :  { %s1322_s16 = smov 112   ;;  %1290 = vset.pattern.permute.xlu0 %v1324_v5  ;;  %1291 = vset.pattern.permute.xlu1 %v1324_v5  ;;  %s1325_s17 = smov 111   ;;  %v1505_v12 = vld [vmem:[%s2050_s2] sm:$0xff]  ;;  %v1510_v13 = vld [vmem:[%s2050_s2 + $0x8] sm:$0xff]  ;;  %vm957_vm10 = vcmask 523264   ;;  %vm1058_vm11 = vcmask 1048064  }
   0x4   :  { %v83_v10 = vsub.s32 1, %v1496_v8  ;;  %v66_v11 = vsub.s32 0, %v1496_v8  ;;  %vm78_vm0 = vcmp.lt.s32.totalorder %v1498_v9, 16  ;;  %vm61_vm1 = vcmp.lt.s32.totalorder %v1498_v9, 17  ;;  %s1326_s18 = smov 64  }
   0x5   :  { %v100_v40 = vsub.s32 2, %v1496_v8  ;;  %v117_v41 = vsub.s32 3, %v1496_v8  ;;  %vm95_vm2 = vcmp.lt.s32.totalorder %v1498_v9, 15  ;;  %vm112_vm3 = vcmp.lt.s32.totalorder %v1498_v9, 1 }
   0x6   :  { %76 = vrot.lane.b32.xlu1 %v1419_v1, %s1316_s20  ;;  %57 = vrot.lane.b32.xlu0 %v1419_v1, %s1317_s21  ;;  %v1515_v16 = vrot.slane %v1505_v12, %v83_v10  ;;  %v1518_v17 = vrot.slane %v1505_v12, %v66_v11  ;;  %v1521_v18 = vrot.slane %v1510_v13, %v66_v11  ;;  %v134_v11 = vsub.s32 5, %v1496_v8 }
   0x7   :  { %v1524_v19 = vrot.slane %v1510_v13, %v83_v10  ;;  %v1554_v50 = vrot.slane %v1505_v12, %v100_v40  ;;  %v1557_v51 = vrot.slane %v1510_v13, %v100_v40  ;;  %v1561_v52 = vrot.slane %v1505_v12, %v117_v41 }
   0x8   :  { %v1564_v53 = vrot.slane %v1510_v13, %v117_v41  ;;  %vm129_vm4 = vcmp.lt.s32.totalorder %v1498_v9, 127  ;;  %vm146_vm5 = vcmp.lt.s32.totalorder %v1498_v9, 113  ;;  %vm163_vm6 = vcmp.lt.s32.totalorder %v1498_v9, 112 }
   0x9   :  { %vm180_vm7 = vcmp.lt.s32.totalorder %v1498_v9, 111 }
   0xa   :  { %280 = vrot.lane.b32.xlu1 %v1428_v2, %s1317_s21  ;;  %278 = vrot.lane.b32.xlu0 %v1433_v3, %s1317_s21 }
   0xe   :  { %288 = vrot.lane.b32.xlu1 %v1428_v2, %s1316_s20  ;;  %286 = vrot.lane.b32.xlu0 %v1433_v3, %s1316_s20 }
  0x12   :  { %93 = vrot.lane.b32.xlu1 %v1419_v1, %s1318_s28  ;;  %91 = vrot.lane.b32.xlu0 %v1410_v0, %s1318_s28 }
  0x16   :  { %110 = vrot.lane.b32.xlu1 %v1419_v1, %s1319_s0  ;;  %108 = vrot.lane.b32.xlu0 %v1410_v0, %s1319_s0 }
  0x1a   :  { %296 = vrot.lane.b32.xlu1 %v1428_v2, %s1318_s28  ;;  %294 = vrot.lane.b32.xlu0 %v1433_v3, %s1318_s28 }
  0x1e   :  { %304 = vrot.lane.b32.xlu1 %v1428_v2, %s1319_s0  ;;  %302 = vrot.lane.b32.xlu0 %v1433_v3, %s1319_s0 }
  0x22   :  { %127 = vrot.lane.b32.xlu1 %v1419_v1, %s1320_s29  ;;  %125 = vrot.lane.b32.xlu0 %v1410_v0, %s1320_s29 }
  0x26   :  { %312 = vrot.lane.b32.xlu1 %v1428_v2, %s1320_s29  ;;  %310 = vrot.lane.b32.xlu0 %v1433_v3, %s1320_s29 }
  0x2a   :  { %144 = vrot.lane.b32.xlu1 %v1419_v1, %s1321_s30  ;;  %142 = vrot.lane.b32.xlu0 %v1410_v0, %s1321_s30 }
  0x2e   :  { %161 = vrot.lane.b32.xlu1 %v1419_v1, %s1322_s16  ;;  %159 = vrot.lane.b32.xlu0 %v1410_v0, %s1322_s16 }
  0x32   :  { %320 = vrot.lane.b32.xlu1 %v1428_v2, %s1321_s30  ;;  %318 = vrot.lane.b32.xlu0 %v1433_v3, %s1321_s30 }
  0x36   :  { %328 = vrot.lane.b32.xlu1 %v1428_v2, %s1322_s16  ;;  %326 = vrot.lane.b32.xlu0 %v1433_v3, %s1322_s16 }
  0x3a   :  { %178 = vrot.lane.b32.xlu1 %v1419_v1, %s1325_s17  ;;  %176 = vrot.lane.b32.xlu0 %v1410_v0, %s1325_s17 }
  0x3e   :  { %336 = vrot.lane.b32.xlu1 %v1428_v2, %s1325_s17  ;;  %334 = vrot.lane.b32.xlu0 %v1433_v3, %s1325_s17 }
  0x42   :  { %197 = vperm.xlu0 %1290, %v194_v6  }
  0x74   :  { %v75_v14 = vpop.permute.xlu1 %74  ;;  %v56_v15 = vpop.permute.xlu0 %55 }
  0x78   :  { %v77_v20 = vpop.permute.xlu1 %76  ;;  %v58_v21 = vpop.permute.xlu0 %57 }
  0x79   :  { %v79_v22 = vsel %vm78_vm0, %v75_v14, %v77_v20  ;;  %v80_v23 = vsel %vm78_vm0, %v77_v20, %v75_v14  ;;  %v62_v24 = vsel %vm61_vm1, %v56_v15, %v58_v21  ;;  %v63_v25 = vsel %vm61_vm1, %v58_v21, %v56_v15 }
  0x7a   :  { %v89_v26 = vmul.f32 %v1515_v16, %v80_v23  ;;  %v72_v27 = vmul.f32 %v1518_v17, %v63_v25  ;;  %v73_v28 = vmul.f32 %v1521_v18, %v62_v24  ;;  %v90_v29 = vmul.f32 %v1524_v19, %v79_v22 }
  0x7b   :  { %v1589_v24 = vrot.slane %v1505_v12, %v134_v11  ;;  %v1592_v25 = vrot.slane %v1510_v13, %v134_v11 }
  0x7c   :  { %v281_v30 = vpop.permute.xlu1 %280  ;;  %v279_v31 = vpop.permute.xlu0 %278  ;;  %v1151_v32 = vpack.c.bf16 %v90_v29, %v73_v28  ;;  %v1153_v33 = vpack.c.bf16 %v89_v26, %v72_v27 }
  0x7d   :  { %v282_v34 = vsel %vm61_vm1, %v279_v31, %v281_v30  ;;  %v283_v35 = vsel %vm61_vm1, %v281_v30, %v279_v31 }
  0x7e   :  { %1152 = vmatprep.subr.bf16.mxu0 %v1151_v32  ;;  %v284_v42 = vmul.f32 %v283_v35, %v1518_v17  ;;  %v285_v44 = vmul.f32 %v282_v34, %v1521_v18 }
  0x7f   :  { %1154 = vmatpush1.bf16.msra.mxu0 %v1153_v33 }
  0x80   :  { %v289_v36 = vpop.permute.xlu1 %288  ;;  %v287_v37 = vpop.permute.xlu0 %286 }
  0x81   :  { %v290_v38 = vsel %vm78_vm0, %v287_v37, %v289_v36  ;;  %v291_v39 = vsel %vm78_vm0, %v289_v36, %v287_v37 }
  0x82   :  { %v292_v43 = vmul.f32 %v291_v39, %v1515_v16  ;;  %v293_v45 = vmul.f32 %v290_v38, %v1524_v19 }
  0x84   :  { %v94_v46 = vpop.permute.xlu1 %93  ;;  %v92_v47 = vpop.permute.xlu0 %91  ;;  %v1167_v48 = vpack.c.bf16 %v293_v45, %v285_v44  ;;  %v1169_v49 = vpack.c.bf16 %v292_v43, %v284_v42  ;;  %v151_v44 = vsub.s32 6, %v1496_v8 }
  0x85   :  { %v96_v54 = vsel %vm95_vm2, %v92_v47, %v94_v46  ;;  %v97_v55 = vsel %vm95_vm2, %v94_v46, %v92_v47  ;;  %v168_v47 = vsub.s32 7, %v1496_v8 }
  0x86   :  { %1168 = vmatprep.subr.bf16.mxu1 %v1167_v48  ;;  %v106_v60 = vmul.f32 %v1554_v50, %v97_v55  ;;  %v107_v61 = vmul.f32 %v1557_v51, %v96_v54  ;;  %v1618_v54 = vrot.slane %v1505_v12, %v151_v44  ;;  %v1621_v55 = vrot.slane %v1510_v13, %v151_v44 }
  0x87   :  { %1170 = vmatpush1.bf16.msra.mxu1 %v1169_v49  ;;  %v1625_v8 = vrot.slane %v1505_v12, %v168_v47 }
  0x88   :  { %v111_v56 = vpop.permute.xlu1 %110  ;;  %v109_v57 = vpop.permute.xlu0 %108 }
  0x89   :  { %v113_v58 = vsel %vm112_vm3, %v109_v57, %v111_v56  ;;  %v114_v59 = vsel %vm112_vm3, %v111_v56, %v109_v57  ;;  %v1628_v56 = vrot.slane %v1510_v13, %v168_v47 }
  0x8a   :  { %v123_v62 = vmul.f32 %v1561_v52, %v114_v59  ;;  %v124_v63 = vmul.f32 %v1564_v53, %v113_v58 }
  0x8c   :  { %v297_v5 = vpop.permute.xlu1 %296  ;;  %v295_v6 = vpop.permute.xlu0 %294  ;;  %v1155_v7 = vpack.c.bf16 %v124_v63, %v107_v61  ;;  %v1157_v10 = vpack.c.bf16 %v123_v62, %v106_v60 }
  0x8d   :  { %v298_v14 = vsel %vm95_vm2, %v295_v6, %v297_v5  ;;  %v299_v15 = vsel %vm95_vm2, %v297_v5, %v295_v6 }
  0x8e   :  { %1156 = vmatprep.subr.bf16.mxu0 %v1155_v7  ;;  %v300_v26 = vmul.f32 %v299_v15, %v1554_v50  ;;  %v301_v27 = vmul.f32 %v298_v14, %v1557_v51 }
  0x8f   :  { %1158 = vmatpush1.bf16.msra.mxu0 %v1157_v10 }
  0x90   :  { %v305_v20 = vpop.permute.xlu1 %304  ;;  %v303_v21 = vpop.permute.xlu0 %302 }
  0x91   :  { %v306_v22 = vsel %vm112_vm3, %v303_v21, %v305_v20  ;;  %v307_v23 = vsel %vm112_vm3, %v305_v20, %v303_v21 }
  0x92   :  { %v308_v28 = vmul.f32 %v307_v23, %v1561_v52  ;;  %v309_v29 = vmul.f32 %v306_v22, %v1564_v53 }
  0x94   :  { %v128_v30 = vpop.permute.xlu1 %127  ;;  %v126_v31 = vpop.permute.xlu0 %125  ;;  %v1171_v32 = vpack.c.bf16 %v309_v29, %v301_v27  ;;  %v1173_v33 = vpack.c.bf16 %v308_v28, %v300_v26  ;;  %v1658_v28 = vld [vmem:[%s2050_s2 + $0x10] ss:$0 sm:$0xff]  ;;  %v1663_v29 = vld [vmem:[%s2050_s2 + $0x18] ss:$0 sm:$0xff] }
  0x95   :  { %v130_v34 = vsel %vm129_vm4, %v126_v31, %v128_v30  ;;  %v131_v35 = vsel %vm129_vm4, %v128_v30, %v126_v31 }
  0x96   :  { %v140_v36 = vmul.f32 %v1589_v24, %v130_v34  ;;  %v141_v37 = vmul.f32 %v1592_v25, %v131_v35  ;;  %1172 = vmatprep.subr.bf16.mxu1 %v1171_v32 }
  0x97   :  { %1174 = vmatpush1.bf16.msra.mxu1 %v1173_v33 }
  0x98   :  { %v313_v38 = vpop.permute.xlu1 %312  ;;  %v311_v39 = vpop.permute.xlu0 %310  ;;  %v1159_v40 = vpack.c.bf16 %v141_v37, %v1419_v1  ;;  %v1161_v41 = vpack.c.bf16 %v140_v36, %v1410_v0 }
  0x99   :  { %v314_v42 = vsel %vm129_vm4, %v311_v39, %v313_v38  ;;  %v315_v43 = vsel %vm129_vm4, %v313_v38, %v311_v39  ;;  %v193_v38 = vld [vmem:[%s2051_s4] sm:$0xff] }
  0x9a   :  { %v316_v45 = vmul.f32 %v314_v42, %v1589_v24  ;;  %v317_v46 = vmul.f32 %v315_v43, %v1592_v25  ;;  %1160 = vmatprep.subr.bf16.mxu0 %v1159_v40 }
  0x9b   :  { %1162 = vmatpush1.bf16.msra.mxu0 %v1161_v41 }
  0x9c   :  { %v145_v48 = vpop.permute.xlu1 %144  ;;  %v143_v0 = vpop.permute.xlu0 %142  ;;  %v1175_v1 = vpack.c.bf16 %v317_v46, %v1428_v2  ;;  %v1177_v49 = vpack.c.bf16 %v316_v45, %v1433_v3 }
  0x9d   :  { %v147_v2 = vsel %vm146_vm5, %v143_v0, %v145_v48  ;;  %v148_v3 = vsel %vm146_vm5, %v145_v48, %v143_v0 }
  0x9e   :  { %1176 = vmatprep.subr.bf16.mxu1 %v1175_v1  ;;  %v157_v12 = vmul.f32 %v1618_v54, %v147_v2  ;;  %v158_v13 = vmul.f32 %v1621_v55, %v148_v3 }
  0x9f   :  { %1178 = vmatpush1.bf16.msra.mxu1 %v1177_v49 }
  0xa0   :  { %v162_v57 = vpop.permute.xlu1 %161  ;;  %v160_v58 = vpop.permute.xlu0 %159 }
  0xa1   :  { %v164_v59 = vsel %vm163_vm6, %v160_v58, %v162_v57  ;;  %v165_v60 = vsel %vm163_vm6, %v162_v57, %v160_v58  ;;  %v444_v57 = vld [vmem:[%s2053_s8] sm:$0xff] }
  0xa2   :  { %v174_v61 = vmul.f32 %v1625_v8, %v164_v59  ;;  %v175_v62 = vmul.f32 %v1628_v56, %v165_v60 }
  0xa4   :  { %v321_v63 = vpop.permute.xlu1 %320  ;;  %v319_v5 = vpop.permute.xlu0 %318  ;;  %v1163_v6 = vpack.c.bf16 %v175_v62, %v158_v13  ;;  %v1165_v7 = vpack.c.bf16 %v174_v61, %v157_v12 }
  0xa5   :  { %v322_v10 = vsel %vm146_vm5, %v319_v5, %v321_v63  ;;  %v323_v11 = vsel %vm146_vm5, %v321_v63, %v319_v5  ;;  %v1077_v5 = vld [vmem:[%s2052_s1 + $0x1] ss:$0 sm:$0xff] }
  0xa6   :  { %1164 = vmatprep.subr.bf16.mxu0 %v1163_v6  ;;  %v324_v22 = vmul.f32 %v322_v10, %v1618_v54  ;;  %v325_v23 = vmul.f32 %v323_v11, %v1621_v55 }
  0xa7   :  { %1166 = vmatpush1.bf16.msra.mxu0 %v1165_v7  ;;  %v636_v7 = vmul.f32 %v1077_v5, %v444_v57 }
  0xa8   :  { %v329_v14 = vpop.permute.xlu1 %328  ;;  %v327_v15 = vpop.permute.xlu0 %326 }
  0xa9   :  { %v330_v20 = vsel %vm163_vm6, %v327_v15, %v329_v14  ;;  %v331_v21 = vsel %vm163_vm6, %v329_v14, %v327_v15  ;;  %v637_v11 = vsel %vm453_vm9, %v636_v7, 0.0  ;;  %v548_v7 = vld [vmem:[%s2057_s11] sm:$0xff] }
  0xaa   :  { %v332_v26 = vmul.f32 %v330_v20, %v1625_v8  ;;  %v333_v27 = vmul.f32 %v331_v21, %v1628_v56 }
  0xac   :  { %v179_v30 = vpop.permute.xlu1 %178  ;;  %v177_v31 = vpop.permute.xlu0 %176  ;;  %v1179_v32 = vpack.c.bf16 %v333_v27, %v325_v23  ;;  %v1181_v33 = vpack.c.bf16 %v332_v26, %v324_v22 }
  0xad   :  { %v181_v34 = vsel %vm180_vm7, %v177_v31, %v179_v30  ;;  %v182_v35 = vsel %vm180_vm7, %v179_v30, %v177_v31 }
  0xae   :  { %v191_v36 = vmul.f32 %v1658_v28, %v181_v34  ;;  %v192_v37 = vmul.f32 %v1663_v29, %v182_v35  ;;  %1180 = vmatprep.subr.bf16.mxu1 %v1179_v32  ;;  %v437_v35 = vld [vmem:[%s2055_s6] sm:$0xff] }
  0xaf   :  { %1182 = vmatpush1.bf16.msra.mxu1 %v1181_v33  ;;  %v457_v33 = vld [vmem:[%s2054_s9] sm:$0xff] }
  0xb0   :  { %v337_v39 = vpop.permute.xlu1 %336  ;;  %220 = vmatprep.subr.mxu0 %v192_v37  ;;  %v335_v40 = vpop.permute.xlu0 %334 }
  0xb1   :  { %v338_v41 = vsel %vm180_vm7, %v335_v40, %v337_v39  ;;  %v339_v42 = vsel %vm180_vm7, %v337_v39, %v335_v40  ;;  %221 = vmatpush1.msra.mxu0 %v191_v36  ;;  %v441_v40 = vld [vmem:[%s2056_s7] sm:$0xff] }
  0xb2   :  { %v340_v43 = vmul.f32 %v1658_v28, %v338_v41  ;;  %v341_v44 = vmul.f32 %v1663_v29, %v339_v42  ;;  %1070 = vmatmul.mubr.msk.f32.vlgmr.msra.gmra.mrb[0].mxu0 %vm200_vm8, %v193_v38 }
  0xb3   :  { %621 = vmatprep.mubr.f32.mxu0 %v1323_v4 }
  0xb4   :  { %358 = vmatprep.subr.mxu1 %v341_v44 }
  0xb5   :  { %359 = vmatpush1.msra.mxu1 %v340_v43 }
  0xb6   :  { %1073 = vmatmul.mubr.msk.f32.vlgmr.msra.gmra.mrb[0].mxu1 %vm200_vm8, %v193_v38 }
  0xb7   :  { %783 = vmatprep.mubr.f32.mxu1 %v1323_v4  ;;  %v1074_v4 = vld [vmem:[%s2052_s1] ss:$0 sm:$0xff] }
  0xb8   :  { %v452_v13 = vmul.f32 %v1074_v4, %v444_v57 }
  0xba   :  { %v454_v6 = vsel %vm453_vm9, %v452_v13, 0.0 }
  0xc1   :  { %v198_v45 = vpop.permute.xlu0 %197 }
 0x185   :  { %v270_v46 = vpop.f32.mrb[0].mxu0 }
 0x186   :  { %v272_v47 = vpop.f32.mrb[1].mxu0  ;;  %v1684_v48 = vadd.f32 %v270_v46, %v198_v45 }
 0x187   :  { %v273_v0 = vadd.f32 %v272_v47, %v198_v45 }
 0x188   :  { %v421_v1 = vmul.f32 %v1684_v48, %v1684_v48 }
 0x189   :  { %v408_v49 = vpop.f32.mrb[0].mxu1  ;;  %v413_v2 = vadd.f32 %v273_v0, %v1684_v48  ;;  %v422_v3 = vmul.f32 %v273_v0, %v273_v0 }
 0x18a   :  { %v409_v58 = vadd.f32 %v408_v49, %v198_v45  ;;  %v410_v59 = vpop.f32.mrb[1].mxu1 }
 0x18b   :  { %v411_v60 = vadd.f32 %v410_v59, %v198_v45  ;;  %414 = vadd.xlane.f32.xlu1 %v413_v2  ;;  %v423_v12 = vadd.f32 %v422_v3, %v421_v1 }
 0x18c   :  { %v427_v62 = vmul.f32 %v409_v58, %v409_v58 }
 0x18d   :  { %v417_v61 = vadd.f32 %v411_v60, %v409_v58  ;;  %v428_v63 = vmul.f32 %v411_v60, %v411_v60 }
 0x18f   :  { %418 = vadd.xlane.f32.xlu0 %v417_v61  ;;  %424 = vadd.xlane.f32.xlu1 %v423_v12  ;;  %v429_v10 = vadd.f32 %v428_v63, %v427_v62 }
 0x193   :  { %430 = vadd.xlane.f32.xlu0 %v429_v10  ;;  %455 = vadd.xlane.f32.xlu1 %v454_v6 }
 0x197   :  { %638 = vadd.xlane.f32.xlu0 %v637_v11 }
 0x218   :  { %v415_v14 = vpop.xlane.xlu1 %414 }
 0x21c   :  { %v419_v15 = vpop.xlane.xlu0 %418  ;;  %v425_v22 = vpop.xlane.xlu1 %424 }
 0x21d   :  { %v420_v20 = vadd.f32 %v419_v15, %v415_v14 }
 0x21f   :  { %v433_v21 = vmul.f32 0.001953125, %v420_v20 }
 0x220   :  { %v431_v23 = vpop.xlane.xlu0 %430  ;;  %v456_v34 = vpop.xlane.xlu1 %455 }
 0x221   :  { %v432_v26 = vadd.f32 %v431_v23, %v425_v22  ;;  %v435_v27 = vmul.f32 %v433_v21, %v433_v21  ;;  %v458_v36 = vadd.f32 %v457_v33, %v456_v34 }
 0x223   :  { %v434_v30 = vmul.f32 0.001953125, %v432_v26  ;;  %v459_v41 = vmax.f32 %v458_v36, 0.0 }
 0x224   :  { %v639_v38 = vpop.xlane.xlu0 %638 }
 0x225   :  { %v436_v31 = vsub.f32 %v434_v30, %v435_v27  ;;  %v640_v42 = vadd.f32 %v639_v38, %v457_v33 }
 0x227   :  { %v438_v32 = vadd.f32 1e-05, %v436_v31  ;;  %v641_v45 = vmax.f32 %v640_v42, 0.0 }
 0x229   :  { %1312 = vrsqrt.f32 %v438_v32 }
 0x233   :  { %v1313_v37 = vpop.eup %1312 }
 0x234   :  { %v440_v39 = vmul.f32 %v1313_v37, %v437_v35 }
 0x236   :  { %462 = vperm.xlu1 %1291, %v440_v39   ;;  %v442_v43 = vmul.f32 %v440_v39, %v433_v21 }
 0x238   :  { %v443_v44 = vsub.f32 %v441_v40, %v442_v43 }
 0x23a   :  { %469 = vperm.xlu0 %1290, %v443_v44   ;;  %478 = vperm.xlu1 %1291, %v459_v41  }
 0x23e   :  { %650 = vperm.xlu1 %1291, %v641_v45  }
 0x2b5   :  { %v463_v46 = vpop.permute.xlu1 %462 }
 0x2b6   :  { %v465_v47 = vmul.f32 %v463_v46, %v1684_v48  ;;  %v466_v1 = vmul.f32 %v463_v46, %v273_v0  ;;  %v642_v57 = vmul.f32 %v463_v46, %v409_v58  ;;  %v643_v4 = vmul.f32 %v463_v46, %v411_v60 }
 0x2b9   :  { %v470_v49 = vpop.permute.xlu0 %469  ;;  %v479_v13 = vpop.permute.xlu1 %478 }
 0x2ba   :  { %v472_v2 = vadd.f32 %v470_v49, %v465_v47  ;;  %v473_v3 = vadd.f32 %v470_v49, %v466_v1  ;;  %v644_v63 = vadd.f32 %v642_v57, %v470_v49  ;;  %v645_v5 = vadd.f32 %v643_v4, %v470_v49 }
 0x2bc   :  { %v474_v59 = vmax.f32 %v472_v2, 0.0  ;;  %v475_v12 = vmax.f32 %v473_v3, 0.0  ;;  %v646_v48 = vmax.f32 %v644_v63, 0.0  ;;  %v647_v0 = vmax.f32 %v645_v5, 0.0 }
 0x2bd   :  { %v651_v6 = vpop.permute.xlu1 %650 }
 0x2be   :  { %v1708_v61 = vadd.f32 %v479_v13, %v474_v59  ;;  %v1710_v62 = vadd.f32 %v479_v13, %v475_v12  ;;  %v1720_v58 = vadd.f32 %v651_v6, %v646_v48  ;;  %v1722_v60 = vadd.f32 %v651_v6, %v647_v0 }
 0x2c0   :  { %485 = vrot.lane.b32.xlu1 %v1710_v62, %s1317_s21  ;;  %483 = vrot.lane.b32.xlu0 %v1708_v61, %s1317_s21 }
 0x2c4   :  { %493 = vrot.lane.b32.xlu1 %v1710_v62, %s1316_s20  ;;  %491 = vrot.lane.b32.xlu0 %v1708_v61, %s1316_s20 }
 0x2c8   :  { %657 = vrot.lane.b32.xlu1 %v1722_v60, %s1317_s21  ;;  %655 = vrot.lane.b32.xlu0 %v1720_v58, %s1317_s21 }
 0x2cc   :  { %665 = vrot.lane.b32.xlu1 %v1722_v60, %s1316_s20  ;;  %663 = vrot.lane.b32.xlu0 %v1720_v58, %s1316_s20 }
 0x2d0   :  { %501 = vrot.lane.b32.xlu1 %v1710_v62, %s1318_s28  ;;  %499 = vrot.lane.b32.xlu0 %v1708_v61, %s1318_s28 }
 0x2d4   :  { %509 = vrot.lane.b32.xlu1 %v1710_v62, %s1319_s0  ;;  %507 = vrot.lane.b32.xlu0 %v1708_v61, %s1319_s0 }
 0x2d8   :  { %673 = vrot.lane.b32.xlu1 %v1722_v60, %s1318_s28  ;;  %671 = vrot.lane.b32.xlu0 %v1720_v58, %s1318_s28 }
 0x2dc   :  { %681 = vrot.lane.b32.xlu1 %v1722_v60, %s1319_s0  ;;  %679 = vrot.lane.b32.xlu0 %v1720_v58, %s1319_s0 }
 0x2e0   :  { %517 = vrot.lane.b32.xlu1 %v1710_v62, %s1320_s29  ;;  %515 = vrot.lane.b32.xlu0 %v1708_v61, %s1320_s29 }
 0x2e4   :  { %689 = vrot.lane.b32.xlu1 %v1722_v60, %s1320_s29  ;;  %687 = vrot.lane.b32.xlu0 %v1720_v58, %s1320_s29 }
 0x2e8   :  { %525 = vrot.lane.b32.xlu1 %v1710_v62, %s1321_s30  ;;  %523 = vrot.lane.b32.xlu0 %v1708_v61, %s1321_s30 }
 0x2ec   :  { %533 = vrot.lane.b32.xlu1 %v1710_v62, %s1322_s16  ;;  %531 = vrot.lane.b32.xlu0 %v1708_v61, %s1322_s16 }
 0x2f0   :  { %697 = vrot.lane.b32.xlu1 %v1722_v60, %s1321_s30  ;;  %695 = vrot.lane.b32.xlu0 %v1720_v58, %s1321_s30 }
 0x2f4   :  { %705 = vrot.lane.b32.xlu1 %v1722_v60, %s1322_s16  ;;  %703 = vrot.lane.b32.xlu0 %v1720_v58, %s1322_s16 }
 0x2f8   :  { %541 = vrot.lane.b32.xlu1 %v1710_v62, %s1325_s17  ;;  %539 = vrot.lane.b32.xlu0 %v1708_v61, %s1325_s17 }
 0x2fc   :  { %713 = vrot.lane.b32.xlu1 %v1722_v60, %s1325_s17  ;;  %711 = vrot.lane.b32.xlu0 %v1720_v58, %s1325_s17 }
 0x300   :  { %551 = vperm.xlu0 %1290, %v548_v7  }
 0x332   :  { %v484_v10 = vpop.permute.xlu0 %483  ;;  %v486_v11 = vpop.permute.xlu1 %485 }
 0x333   :  { %v487_v14 = vsel %vm61_vm1, %v484_v10, %v486_v11  ;;  %v488_v15 = vsel %vm61_vm1, %v486_v11, %v484_v10 }
 0x334   :  { %v489_v26 = vmul.f32 %v488_v15, %v1518_v17  ;;  %v490_v27 = vmul.f32 %v487_v14, %v1521_v18 }
 0x336   :  { %v492_v20 = vpop.permute.xlu0 %491  ;;  %v494_v21 = vpop.permute.xlu1 %493 }
 0x337   :  { %v495_v22 = vsel %vm78_vm0, %v492_v20, %v494_v21  ;;  %v496_v23 = vsel %vm78_vm0, %v494_v21, %v492_v20 }
 0x338   :  { %v497_v30 = vmul.f32 %v496_v23, %v1515_v16  ;;  %v498_v31 = vmul.f32 %v495_v22, %v1524_v19 }
 0x33a   :  { %v1185_v32 = vpack.c.bf16 %v497_v30, %v489_v26  ;;  %v656_v33 = vpop.permute.xlu0 %655  ;;  %v658_v34 = vpop.permute.xlu1 %657  ;;  %v1183_v35 = vpack.c.bf16 %v498_v31, %v490_v27 }
 0x33b   :  { %v659_v36 = vsel %vm61_vm1, %v656_v33, %v658_v34  ;;  %v660_v37 = vsel %vm61_vm1, %v658_v34, %v656_v33 }
 0x33c   :  { %1184 = vmatprep.subr.bf16.mxu0 %v1183_v35  ;;  %v661_v42 = vmul.f32 %v660_v37, %v1518_v17  ;;  %v662_v43 = vmul.f32 %v659_v36, %v1521_v18 }
 0x33d   :  { %1186 = vmatpush1.bf16.msra.mxu0 %v1185_v32 }
 0x33e   :  { %v664_v38 = vpop.permute.xlu0 %663  ;;  %v666_v39 = vpop.permute.xlu1 %665 }
 0x33f   :  { %v667_v40 = vsel %vm78_vm0, %v664_v38, %v666_v39  ;;  %v668_v41 = vsel %vm78_vm0, %v666_v39, %v664_v38 }
 0x340   :  { %v669_v44 = vmul.f32 %v668_v41, %v1515_v16  ;;  %v670_v45 = vmul.f32 %v667_v40, %v1524_v19 }
 0x342   :  { %v1201_v46 = vpack.c.bf16 %v669_v44, %v661_v42  ;;  %v500_v47 = vpop.permute.xlu0 %499  ;;  %v502_v1 = vpop.permute.xlu1 %501  ;;  %v1199_v49 = vpack.c.bf16 %v670_v45, %v662_v43 }
 0x343   :  { %v503_v2 = vsel %vm95_vm2, %v500_v47, %v502_v1  ;;  %v504_v3 = vsel %vm95_vm2, %v502_v1, %v500_v47 }
 0x344   :  { %1200 = vmatprep.subr.bf16.mxu1 %v1199_v49  ;;  %v505_v19 = vmul.f32 %v504_v3, %v1554_v50  ;;  %v506_v4 = vmul.f32 %v503_v2, %v1557_v51 }
 0x345   :  { %1202 = vmatpush1.bf16.msra.mxu1 %v1201_v46 }
 0x346   :  { %v508_v57 = vpop.permute.xlu0 %507  ;;  %v510_v17 = vpop.permute.xlu1 %509 }
 0x347   :  { %v511_v18 = vsel %vm112_vm3, %v508_v57, %v510_v17  ;;  %v512_v16 = vsel %vm112_vm3, %v510_v17, %v508_v57 }
 0x348   :  { %v513_v59 = vmul.f32 %v512_v16, %v1561_v52  ;;  %v514_v12 = vmul.f32 %v511_v18, %v1564_v53 }
 0x34a   :  { %v1189_v13 = vpack.c.bf16 %v513_v59, %v505_v19  ;;  %v672_v63 = vpop.permute.xlu0 %671  ;;  %v674_v5 = vpop.permute.xlu1 %673  ;;  %v1187_v48 = vpack.c.bf16 %v514_v12, %v506_v4 }
 0x34b   :  { %v675_v0 = vsel %vm95_vm2, %v672_v63, %v674_v5  ;;  %v676_v6 = vsel %vm95_vm2, %v674_v5, %v672_v63 }
 0x34c   :  { %1188 = vmatprep.subr.bf16.mxu0 %v1187_v48  ;;  %v677_v15 = vmul.f32 %v676_v6, %v1554_v50  ;;  %v678_v20 = vmul.f32 %v675_v0, %v1557_v51 }
 0x34d   :  { %1190 = vmatpush1.bf16.msra.mxu0 %v1189_v13 }
 0x34e   :  { %v680_v7 = vpop.permute.xlu0 %679  ;;  %v682_v10 = vpop.permute.xlu1 %681 }
 0x34f   :  { %v683_v11 = vsel %vm112_vm3, %v680_v7, %v682_v10  ;;  %v684_v14 = vsel %vm112_vm3, %v682_v10, %v680_v7 }
 0x350   :  { %v685_v21 = vmul.f32 %v684_v14, %v1561_v52  ;;  %v686_v22 = vmul.f32 %v683_v11, %v1564_v53 }
 0x352   :  { %v1205_v23 = vpack.c.bf16 %v685_v21, %v677_v15  ;;  %v516_v26 = vpop.permute.xlu0 %515  ;;  %v518_v27 = vpop.permute.xlu1 %517  ;;  %v1203_v30 = vpack.c.bf16 %v686_v22, %v678_v20 }
 0x353   :  { %v519_v31 = vsel %vm129_vm4, %v516_v26, %v518_v27  ;;  %v520_v32 = vsel %vm129_vm4, %v518_v27, %v516_v26 }
 0x354   :  { %v521_v33 = vmul.f32 %v519_v31, %v1589_v24  ;;  %v522_v50 = vmul.f32 %v520_v32, %v1592_v25  ;;  %1204 = vmatprep.subr.bf16.mxu1 %v1203_v30 }
 0x355   :  { %1206 = vmatpush1.bf16.msra.mxu1 %v1205_v23 }
 0x356   :  { %v1193_v51 = vpack.c.bf16 %v521_v33, %v1708_v61  ;;  %v688_v52 = vpop.permute.xlu0 %687  ;;  %v690_v53 = vpop.permute.xlu1 %689  ;;  %v1191_v34 = vpack.c.bf16 %v522_v50, %v1710_v62 }
 0x357   :  { %v691_v35 = vsel %vm129_vm4, %v688_v52, %v690_v53  ;;  %v692_v36 = vsel %vm129_vm4, %v690_v53, %v688_v52 }
 0x358   :  { %v693_v37 = vmul.f32 %v691_v35, %v1589_v24  ;;  %v694_v38 = vmul.f32 %v692_v36, %v1592_v25  ;;  %1192 = vmatprep.subr.bf16.mxu0 %v1191_v34 }
 0x359   :  { %1194 = vmatpush1.bf16.msra.mxu0 %v1193_v51 }
 0x35a   :  { %v1209_v39 = vpack.c.bf16 %v693_v37, %v1720_v58  ;;  %v524_v40 = vpop.permute.xlu0 %523  ;;  %v526_v61 = vpop.permute.xlu1 %525  ;;  %v1207_v41 = vpack.c.bf16 %v694_v38, %v1722_v60 }
 0x35b   :  { %v527_v62 = vsel %vm146_vm5, %v524_v40, %v526_v61  ;;  %v528_v42 = vsel %vm146_vm5, %v526_v61, %v524_v40 }
 0x35c   :  { %1208 = vmatprep.subr.bf16.mxu1 %v1207_v41  ;;  %v529_v44 = vmul.f32 %v527_v62, %v1618_v54  ;;  %v530_v60 = vmul.f32 %v528_v42, %v1621_v55 }
 0x35d   :  { %1210 = vmatpush1.bf16.msra.mxu1 %v1209_v39 }
 0x35e   :  { %v532_v43 = vpop.permute.xlu0 %531  ;;  %v534_v24 = vpop.permute.xlu1 %533 }
 0x35f   :  { %v535_v25 = vsel %vm163_vm6, %v532_v43, %v534_v24  ;;  %v536_v58 = vsel %vm163_vm6, %v534_v24, %v532_v43 }
 0x360   :  { %v537_v45 = vmul.f32 %v535_v25, %v1625_v8  ;;  %v538_v46 = vmul.f32 %v536_v58, %v1628_v56  ;;  %v814_v25 = vld [vmem:[%s2059_s12] sm:$0xff] }
 0x362   :  { %v1197_v47 = vpack.c.bf16 %v537_v45, %v529_v44  ;;  %v696_v1 = vpop.permute.xlu0 %695  ;;  %v698_v49 = vpop.permute.xlu1 %697  ;;  %v1195_v2 = vpack.c.bf16 %v538_v46, %v530_v60  ;;  %v818_v60 = vld [vmem:[%s2060_s13] sm:$0xff] }
 0x363   :  { %v699_v3 = vsel %vm146_vm5, %v696_v1, %v698_v49  ;;  %v700_v57 = vsel %vm146_vm5, %v698_v49, %v696_v1 }
 0x364   :  { %1196 = vmatprep.subr.bf16.mxu0 %v1195_v2  ;;  %v701_v4 = vmul.f32 %v699_v3, %v1618_v54  ;;  %v702_v59 = vmul.f32 %v700_v57, %v1621_v55  ;;  %v547_v55 = vld [vmem:[%s2058_s10] sm:$0xff] }
 0x365   :  { %1198 = vmatpush1.bf16.msra.mxu0 %v1197_v47 }
 0x366   :  { %v704_v17 = vpop.permute.xlu0 %703  ;;  %v706_v18 = vpop.permute.xlu1 %705 }
 0x367   :  { %v707_v16 = vsel %vm163_vm6, %v704_v17, %v706_v18  ;;  %v708_v19 = vsel %vm163_vm6, %v706_v18, %v704_v17 }
 0x368   :  { %v709_v12 = vmul.f32 %v707_v16, %v1625_v8  ;;  %v710_v13 = vmul.f32 %v708_v19, %v1628_v56 }
 0x36a   :  { %v1213_v63 = vpack.c.bf16 %v709_v12, %v701_v4  ;;  %v540_v5 = vpop.permute.xlu0 %539  ;;  %v542_v48 = vpop.permute.xlu1 %541  ;;  %v1211_v0 = vpack.c.bf16 %v710_v13, %v702_v59  ;;  %v837_v4 = vld [vmem:[%s2061_s3 + $0x80] sm:$0xff]  ;;  %v838_v59 = vld [vmem:[%s2061_s3 + $0x88] sm:$0xff] }
 0x36b   :  { %v543_v6 = vsel %vm180_vm7, %v540_v5, %v542_v48  ;;  %v544_v7 = vsel %vm180_vm7, %v542_v48, %v540_v5  ;;  %v821_v12 = vld [vmem:[%s2061_s3] sm:$0xff] }
 0x36c   :  { %v545_v10 = vmul.f32 %v1658_v28, %v543_v6  ;;  %v546_v54 = vmul.f32 %v1663_v29, %v544_v7  ;;  %1212 = vmatprep.subr.bf16.mxu1 %v1211_v0  ;;  %v822_v0 = vld [vmem:[%s2061_s3 + $0x8] sm:$0xff]  ;;  %v839_v6 = vld [vmem:[%s2061_s3 + $0x90] sm:$0xff]  ;;  %v1215_v7 = vpack.c.bf16 %v838_v59, %v837_v4 }
 0x36d   :  { %1214 = vmatpush1.bf16.msra.mxu1 %v1213_v63 }
 0x36e   :  { %v712_v8 = vpop.permute.xlu0 %711  ;;  %573 = vmatprep.subr.mxu0 %v546_v54  ;;  %v714_v56 = vpop.permute.xlu1 %713  ;;  %v840_v54 = vld [vmem:[%s2061_s3 + $0x98] sm:$0xff] }
 0x36f   :  { %v715_v11 = vsel %vm180_vm7, %v712_v8, %v714_v56  ;;  %v716_v14 = vsel %vm180_vm7, %v714_v56, %v712_v8  ;;  %574 = vmatpush1.msra.mxu0 %v545_v10  ;;  %v1217_v10 = vpack.c.bf16 %v822_v0, %v821_v12  ;;  %v1219_v56 = vpack.c.bf16 %v840_v54, %v839_v6 }
 0x370   :  { %v717_v15 = vmul.f32 %v1658_v28, %v715_v11  ;;  %v718_v20 = vmul.f32 %v1663_v29, %v716_v14  ;;  %1075 = vmatmul.mubr.msk.f32.vlgmr.msra.gmra.mrb[2].mxu0 %vm200_vm8, %v547_v55  ;;  %v823_v11 = vld [vmem:[%s2061_s3 + $0x10] sm:$0xff]  ;;  %v824_v14 = vld [vmem:[%s2061_s3 + $0x18] sm:$0xff]  ;;  %1216 = vmatprep.subr.bf16.mxu0 %v1215_v7 }
 0x371   :  { %1218 = vmatpush3.bf16.msra.mxu0 %v1217_v10 }
 0x372   :  { %735 = vmatprep.subr.mxu1 %v718_v20  ;;  %v842_v20 = vld [vmem:[%s2061_s3 + $0xa8] sm:$0xff]  ;;  %1220 = vmatprep.subr.bf16.mxu0 %v1219_v56 }
 0x373   :  { %736 = vmatpush1.msra.mxu1 %v717_v15  ;;  %v841_v15 = vld [vmem:[%s2061_s3 + $0xa0] sm:$0xff] }
 0x374   :  { %1078 = vmatmul.mubr.msk.f32.vlgmr.msra.gmra.mrb[2].mxu1 %vm200_vm8, %v547_v55  ;;  %1248 = vmatprep.subr.bf16.mxu1 %v1215_v7 }
 0x375   :  { %1250 = vmatpush3.bf16.msra.mxu1 %v1217_v10 }
 0x376   :  { %1252 = vmatprep.subr.bf16.mxu1 %v1219_v56 }
 0x37f   :  { %v552_v21 = vpop.permute.xlu0 %551 }
 0x443   :  { %v623_v22 = vpop.f32.mrb[2].mxu0 }
 0x444   :  { %v624_v23 = vadd.f32 %v623_v22, %v552_v21  ;;  %v625_v26 = vpop.f32.mrb[3].mxu0  ;;  %v1223_v22 = vpack.c.bf16 %v842_v20, %v841_v15 }
 0x445   :  { %v626_v27 = vadd.f32 %v625_v26, %v552_v21  ;;  %v826_v26 = vld [vmem:[%s2061_s3 + $0x28] sm:$0xff] }
 0x446   :  { %v798_v52 = vmul.f32 %v624_v23, %v624_v23 }
 0x447   :  { %v785_v30 = vpop.f32.mrb[2].mxu1  ;;  %v790_v31 = vadd.f32 %v626_v27, %v624_v23  ;;  %v799_v53 = vmul.f32 %v626_v27, %v626_v27 }
 0x448   :  { %v786_v32 = vadd.f32 %v785_v30, %v552_v21  ;;  %v787_v33 = vpop.f32.mrb[3].mxu1  ;;  %v844_v30 = vld [vmem:[%s2061_s3 + $0xb8] sm:$0xff] }
 0x449   :  { %v788_v50 = vadd.f32 %v787_v33, %v552_v21  ;;  %791 = vadd.xlane.f32.xlu1 %v790_v31  ;;  %v800_v35 = vadd.f32 %v799_v53, %v798_v52  ;;  %v1221_v21 = vpack.c.bf16 %v824_v14, %v823_v11  ;;  %v827_v33 = vld [vmem:[%s2061_s3 + $0x30] sm:$0xff]  ;;  %v829_v53 = vld [vmem:[%s2061_s3 + $0x40] sm:$0xff] }
 0x44a   :  { %v804_v28 = vmul.f32 %v786_v32, %v786_v32 }
 0x44b   :  { %v794_v51 = vadd.f32 %v788_v50, %v786_v32  ;;  %v805_v29 = vmul.f32 %v788_v50, %v788_v50  ;;  %1222 = vmatpush3.bf16.msra.mxu0 %v1221_v21  ;;  %1254 = vmatpush3.bf16.msra.mxu1 %v1221_v21 }
 0x44c   :  { %1224 = vmatprep.subr.bf16.mxu0 %v1223_v22  ;;  %1256 = vmatprep.subr.bf16.mxu1 %v1223_v22 }
 0x44d   :  { %795 = vadd.xlane.f32.xlu0 %v794_v51  ;;  %v806_v34 = vadd.f32 %v805_v29, %v804_v28  ;;  %v845_v28 = vld [vmem:[%s2061_s3 + $0xc0] sm:$0xff]  ;;  %v846_v51 = vld [vmem:[%s2061_s3 + $0xc8] sm:$0xff] }
 0x44e   :  { %v1231_v52 = vpack.c.bf16 %v846_v51, %v845_v28 }
 0x44f   :  { %807 = vadd.xlane.f32.xlu1 %v806_v34  ;;  %v830_v34 = vld [vmem:[%s2061_s3 + $0x48] sm:$0xff] }
 0x451   :  { %801 = vadd.xlane.f32.xlu0 %v800_v35  ;;  %v847_v35 = vld [vmem:[%s2061_s3 + $0xd0] sm:$0xff] }
 0x4d6   :  { %v792_v36 = vpop.xlane.xlu1 %791 }
 0x4da   :  { %v796_v37 = vpop.xlane.xlu0 %795 }
 0x4db   :  { %v797_v38 = vadd.f32 %v796_v37, %v792_v36  ;;  %v848_v36 = vld [vmem:[%s2061_s3 + $0xd8] sm:$0xff]  ;;  %v1233_v37 = vpack.c.bf16 %v830_v34, %v829_v53 }
 0x4dc   :  { %v808_v40 = vpop.xlane.xlu1 %807 }
 0x4dd   :  { %v810_v39 = vmul.f32 0.001953125, %v797_v38  ;;  %v1235_v38 = vpack.c.bf16 %v848_v36, %v847_v35 }
 0x4de   :  { %v802_v61 = vpop.xlane.xlu0 %801 }
 0x4df   :  { %v809_v41 = vadd.f32 %v808_v40, %v802_v61  ;;  %v812_v62 = vmul.f32 %v810_v39, %v810_v39  ;;  %v832_v40 = vld [vmem:[%s2061_s3 + $0x58] sm:$0xff]  ;;  %v849_v61 = vld [vmem:[%s2061_s3 + $0xe0] sm:$0xff] }
 0x4e1   :  { %v811_v42 = vmul.f32 0.001953125, %v809_v41  ;;  %v850_v41 = vld [vmem:[%s2061_s3 + $0xe8] sm:$0xff] }
 0x4e3   :  { %v813_v43 = vsub.f32 %v811_v42, %v812_v62  ;;  %v1239_v42 = vpack.c.bf16 %v850_v41, %v849_v61 }
 0x4e5   :  { %v815_v24 = vadd.f32 1e-05, %v813_v43  ;;  %v833_v43 = vld [vmem:[%s2061_s3 + $0x60] sm:$0xff] }
 0x4e7   :  { %1314 = vrsqrt.f32 %v815_v24  ;;  %v834_v24 = vld [vmem:[%s2061_s3 + $0x68] sm:$0xff] }
 0x4f1   :  { %v1315_v58 = vpop.eup %1314 }
 0x4f2   :  { %v817_v44 = vmul.f32 %v1315_v58, %v814_v25  ;;  %v1241_v25 = vpack.c.bf16 %v834_v24, %v833_v43  ;;  %v851_v58 = vld [vmem:[%s2061_s3 + $0xf0] sm:$0xff] }
 0x4f4   :  { %855 = vperm.xlu0 %1290, %v817_v44   ;;  %v819_v45 = vmul.f32 %v817_v44, %v810_v39  ;;  %v831_v39 = vld [vmem:[%s2061_s3 + $0x50] sm:$0xff]  ;;  %v852_v44 = vld [vmem:[%s2061_s3 + $0xf8] sm:$0xff] }
 0x4f5   :  { %v1237_v62 = vpack.c.bf16 %v832_v40, %v831_v39 }
 0x4f6   :  { %v820_v46 = vsub.f32 %v818_v60, %v819_v45  ;;  %v1243_v60 = vpack.c.bf16 %v852_v44, %v851_v58  ;;  %v835_v45 = vld [vmem:[%s2061_s3 + $0x70] sm:$0xff] }
 0x4f8   :  { %862 = vperm.xlu1 %1291, %v820_v46   ;;  %v836_v46 = vld [vmem:[%s2061_s3 + $0x78] sm:$0xff] }
 0x573   :  { %v856_v47 = vpop.permute.xlu0 %855 }
 0x574   :  { %v858_v1 = vmul.f32 %v856_v47, %v624_v23  ;;  %v859_v49 = vmul.f32 %v856_v47, %v626_v27  ;;  %v959_v2 = vmul.f32 %v856_v47, %v786_v32  ;;  %v960_v3 = vmul.f32 %v856_v47, %v788_v50  ;;  %v825_v23 = vld [vmem:[%s2061_s3 + $0x20] sm:$0xff]  ;;  %v843_v27 = vld [vmem:[%s2061_s3 + $0xb0] sm:$0xff]  ;;  %v828_v50 = vld [vmem:[%s2061_s3 + $0x38] sm:$0xff] }
 0x575   :  { %v1225_v31 = vpack.c.bf16 %v826_v26, %v825_v23  ;;  %v1227_v32 = vpack.c.bf16 %v844_v30, %v843_v27  ;;  %v1229_v29 = vpack.c.bf16 %v828_v50, %v827_v33  ;;  %v1245_v47 = vpack.c.bf16 %v836_v46, %v835_v45 }
 0x577   :  { %v863_v57 = vpop.permute.xlu1 %862  ;;  %1226 = vmatpush3.bf16.msra.mxu0 %v1225_v31  ;;  %1258 = vmatpush3.bf16.msra.mxu1 %v1225_v31 }
 0x578   :  { %v865_v17 = vadd.f32 %v863_v57, %v858_v1  ;;  %v866_v18 = vadd.f32 %v863_v57, %v859_v49  ;;  %v961_v16 = vadd.f32 %v959_v2, %v863_v57  ;;  %v962_v19 = vadd.f32 %v960_v3, %v863_v57  ;;  %1228 = vmatprep.subr.bf16.mxu0 %v1227_v32 }
 0x579   :  { %1260 = vmatprep.subr.bf16.mxu1 %v1227_v32 }
 0x57a   :  { %v1903_v13 = vmax.f32 %v865_v17, 0.0  ;;  %v1905_v63 = vmax.f32 %v866_v18, 0.0  ;;  %v1907_v5 = vmax.f32 %v961_v16, 0.0  ;;  %v1909_v48 = vmax.f32 %v962_v19, 0.0 }
 0x57b   :  { %1230 = vmatpush3.bf16.msra.mxu0 %v1229_v29  ;;  %1262 = vmatpush3.bf16.msra.mxu1 %v1229_v29 }
 0x57c   :  { %869 = vst [vmem:[%s2062_s14] sm:$0xff] %v1903_v13  ;;  %870 = vst [vmem:[%s2062_s14 + $0x8] sm:$0xff] %v1905_v63  ;;  %v1297_v55 = vpack.i.bf16 %v1905_v63, %v1903_v13  ;;  %v1292_v8 = vpack.i.bf16 %v1909_v48, %v1907_v5  ;;  %1232 = vmatprep.subr.bf16.mxu0 %v1231_v52  ;;  %1264 = vmatprep.subr.bf16.mxu1 %v1231_v52 }
 0x57d   :  { %1079 = vst [vmem:[%s2062_s14 + $0x10] sm:$0xff] %v1907_v5  ;;  %1080 = vst [vmem:[%s2062_s14 + $0x18] sm:$0xff] %v1909_v48 }
 0x57e   :  { %1298 = vrot.lane.b32.xlu0 %v1297_v55, %s1320_s29  ;;  %1293 = vrot.lane.b32.xlu1 %v1292_v8, %s1320_s29 }
 0x57f   :  { %1234 = vmatpush3.bf16.msra.mxu0 %v1233_v37  ;;  %1266 = vmatpush3.bf16.msra.mxu1 %v1233_v37 }
 0x580   :  { %1236 = vmatprep.subr.bf16.mxu0 %v1235_v38  ;;  %1268 = vmatprep.subr.bf16.mxu1 %v1235_v38 }
 0x583   :  { %1238 = vmatpush3.bf16.msra.mxu0 %v1237_v62  ;;  %1270 = vmatpush3.bf16.msra.mxu1 %v1237_v62 }
 0x584   :  { %1240 = vmatprep.subr.bf16.mxu0 %v1239_v42  ;;  %1272 = vmatprep.subr.bf16.mxu1 %v1239_v42 }
 0x587   :  { %1242 = vmatpush3.bf16.msra.mxu0 %v1241_v25  ;;  %1274 = vmatpush3.bf16.msra.mxu1 %v1241_v25 }
 0x588   :  { %1244 = vmatprep.subr.bf16.mxu0 %v1243_v60  ;;  %1276 = vmatprep.subr.bf16.mxu1 %v1243_v60 }
 0x58b   :  { %1246 = vmatpush3.bf16.msra.mxu0 %v1245_v47  ;;  %1278 = vmatpush3.bf16.msra.mxu1 %v1245_v47 }
 0x5f0   :  { %v1299_v1 = vpop.permute.xlu0 %1298  ;;  %v1294_v49 = vpop.permute.xlu1 %1293 }
 0x5f1   :  { %v1301_v2 = vunpack.i.h.bf16 %v1299_v1  ;;  %v1300_v3 = vunpack.i.l.bf16 %v1299_v1  ;;  %v1296_v57 = vunpack.i.h.bf16 %v1294_v49  ;;  %v1295_v17 = vunpack.i.l.bf16 %v1294_v49 }
 0x5f3   :  { %v875_v18 = vsel %vm129_vm4, %v1300_v3, %v1301_v2  ;;  %v876_v16 = vsel %vm129_vm4, %v1301_v2, %v1300_v3  ;;  %v972_v19 = vsel %vm129_vm4, %v1295_v17, %v1296_v57  ;;  %v973_v4 = vsel %vm129_vm4, %v1296_v57, %v1295_v17 }
 0x5f4   :  { %v877_v59 = vmax.f32 %v1903_v13, %v875_v18  ;;  %v878_v12 = vmax.f32 %v1905_v63, %v876_v16  ;;  %v974_v0 = vmax.f32 %v1907_v5, %v972_v19  ;;  %v975_v6 = vmax.f32 %v1909_v48, %v973_v4 }
 0x5f6   :  { %v1307_v7 = vpack.i.bf16 %v878_v12, %v877_v59  ;;  %v1302_v10 = vpack.i.bf16 %v975_v6, %v974_v0 }
 0x5f8   :  { %1308 = vrot.lane.b32.xlu0 %v1307_v7, %s1322_s16  ;;  %1303 = vrot.lane.b32.xlu1 %v1302_v10, %s1322_s16 }
 0x66a   :  { %v1309_v54 = vpop.permute.xlu0 %1308  ;;  %v1304_v55 = vpop.permute.xlu1 %1303 }
 0x66b   :  { %v1311_v8 = vunpack.i.h.bf16 %v1309_v54  ;;  %v1310_v56 = vunpack.i.l.bf16 %v1309_v54  ;;  %v1306_v11 = vunpack.i.h.bf16 %v1304_v55  ;;  %v1305_v14 = vunpack.i.l.bf16 %v1304_v55 }
 0x66d   :  { %v883_v13 = vsel %vm163_vm6, %v1310_v56, %v1311_v8  ;;  %v980_v63 = vsel %vm163_vm6, %v1305_v14, %v1306_v11  ;;  %v884_v5 = vsel %vm163_vm6, %v1311_v8, %v1310_v56  ;;  %v981_v48 = vsel %vm163_vm6, %v1306_v11, %v1305_v14 }
 0x66e   :  { %v885_v15 = vmax.f32 %v877_v59, %v883_v13  ;;  %v982_v20 = vmax.f32 %v974_v0, %v980_v63  ;;  %v886_v21 = vmax.f32 %v878_v12, %v884_v5  ;;  %v983_v22 = vmax.f32 %v975_v6, %v981_v48 }
 0x670   :  { %951 = vmatprep.mubr.f32.mxu0 %v886_v21  ;;  %1048 = vmatprep.mubr.f32.mxu1 %v983_v22 }
 0x671   :  { %952 = vmatmul.mubr.f32.vlgmr.msra.gmra.mrb[4].mxu0 %v885_v15  ;;  %1049 = vmatmul.mubr.f32.vlgmr.msra.gmra.mrb[4].mxu1 %v982_v20 }
 0x744   :  { %v1113_v23 = vpop.f32.mrb[4].mxu0  ;;  %v1148_v26 = vpop.f32.mrb[4].mxu1 }
 0x745   :  { %v1114_v27 = vpop.f32.mrb[5].mxu0  ;;  %v1149_v30 = vpop.f32.mrb[5].mxu1 }
 0x746   :  { %v1115_v31 = vadd.f32 %v1114_v27, %v1113_v23  ;;  %v1150_v32 = vadd.f32 %v1149_v30, %v1148_v26 }
 0x748   :  { %958 = vst.msk [vmem:[%s2063_s15] sm:$0xff] %vm957_vm10, %v1115_v31  ;;  %1055 = vrot.lane.b32.xlu1 %v1150_v32, %s1326_s18 }
 0x7ba   :  { %v1056_v9 = vpop.permute.xlu1 %1055 }
 0x7bb   :  { %1059 = vst.msk [vmem:[%s2063_s15] sm:$0xff] %vm1058_vm11, %v1056_v9 }

</bundles_post_ra>
